<compile_context>
chip_gen: v6e
topology: v6e:2x2x1
jax: 0.10.0
libtpu: 0.0.40
codegen_flags: <defaults>
</compile_context>

<pallas_src>
import functools

import jax
import jax.numpy as jnp
import numpy as np
from jax import lax
from jax.experimental import pallas as pl
from jax.experimental.pallas import tpu as pltpu

RMS_EPS = 1e-6


# --------------------------- in-kernel helpers ------------------------------
def _silu(x):
    # sigmoid via EUP exp + approximate reciprocal (keeps the VPU free);
    # deviation from exact f32 sigmoid is ~1e-3 relative.
    return x * pl.reciprocal(1.0 + jnp.exp(-x), approx=True)


def _softplus(x):
    return jnp.maximum(x, 0.0) + jnp.log(1.0 + jnp.exp(-jnp.abs(x)))


def _mxu(x, w):
    # activation cast to bf16; weights are already stored in bf16.
    return jnp.dot(x.astype(jnp.bfloat16), w, preferred_element_type=jnp.float32)


# ---------------------------------------------------------------------------
# Fused kernel: grid = (batch_blocks, layer).  The output block (same index
# for all layers of a batch block) stays resident in VMEM and carries the
# residual stream from layer to layer.
# ---------------------------------------------------------------------------
def mamba_fused_kernel(seq_ref, wrms_ref, smallp_ref, win_ref, wdu_ref,
                       wd2_ref, wout_ref, out_ref,
                       u_sc, dlt_sc, g_sc, bc_sc, y_sc, abar_sc, hch_sc,
                       *, BB, L_pad, d_input, d_model, d_state, d_discr_pad,
                       ker_size, Tc):
    layer = pl.program_id(1)
    M = BB * L_pad
    K = ker_size
    S = d_state

    # Seed the resident residual stream with the raw input on the first layer.
    @pl.when(layer == 0)
    def _():
        out_ref[...] = seq_ref[...]

    x = out_ref[...]                                     # (BB, L_pad, d_in_pad)

    # ---- RMSNorm over the true d_input lanes (pad lanes are zero) ----
    ms = jnp.sum(x * x, axis=-1, keepdims=True) * (1.0 / d_input)
    xn = x * lax.rsqrt(ms + RMS_EPS) * wrms_ref[0]

    # ---- in_proj: Linear(d_in_pad -> 2*d_model), split into (conv, gate) ----
    proj = _mxu(xn.reshape(M, -1), win_ref[0])           # (M, 2*d_model)
    a2 = proj[:, :d_model]
    g_sc[...] = proj[:, d_model:].reshape(BB, L_pad, d_model)

    # ---- depthwise causal Conv1d (roll + per-sequence causal mask) ----
    t_mod = lax.broadcasted_iota(jnp.int32, (BB, L_pad, d_model), 1
                                 ).reshape(M, d_model)   # within-seq time idx
    conv = a2 * smallp_ref[0, S + K - 1:S + K, :]        # tap with zero shift
    for k in range(K - 1):
        sh = K - 1 - k                                   # static shift > 0
        a_sh = pltpu.roll(a2, shift=sh, axis=0)          # XLU sublane rotate
        a_sh = jnp.where(t_mod < sh, 0.0, a_sh)          # causal / seq mask
        conv = conv + a_sh * smallp_ref[0, S + k:S + k + 1, :]
    conv = conv + smallp_ref[0, S + K:S + K + 1, :]      # conv bias
    u2 = _silu(conv)                                     # (M, d_model)
    u_sc[...] = u2.reshape(BB, L_pad, d_model)

    # ---- SSM input projections: one packed matmul -> [discr | B | C] ----
    p2 = _mxu(u2, wdu_ref[0])                            # (M, d_discr_pad+2S)
    bc_sc[...] = p2[:, d_discr_pad:].reshape(BB, L_pad, 2 * S)
    dlt2 = _mxu(p2[:, :d_discr_pad], wd2_ref[0])         # (M, d_model)
    d_vec = smallp_ref[0, S + K + 1:S + K + 2, :]        # (1, d_model)
    dlt_sc[...] = _softplus(d_vec + dlt2).reshape(BB, L_pad, d_model)

    exp_a = smallp_ref[0, 0:S, :]                        # (S, d_model)
    eye_s = (lax.broadcasted_iota(jnp.int32, (S, S), 0)
             == lax.broadcasted_iota(jnp.int32, (S, S), 1)).astype(jnp.float32)

    n_chunks = L_pad // Tc

    # ---- chunked selective scan ----
    def chunk_body(c, h):
        off = pl.multiple_of(c * Tc, Tc)
        dlt_ch = dlt_sc[:, pl.ds(off, Tc), :]            # (BB, Tc, d_model)
        u_ch = u_sc[:, pl.ds(off, Tc), :]
        bc_ch = bc_sc[:, pl.ds(off, Tc), :]              # (BB, Tc, 2S)
        # (1,s)->(s,1) relayout for the whole chunk at once.
        b_col = jnp.sum(bc_ch[:, :, None, :S] * eye_s,
                        axis=-1, keepdims=True)          # (BB, Tc, S, 1)
        c_col = jnp.sum(bc_ch[:, :, None, S:] * eye_s,
                        axis=-1, keepdims=True)          # (BB, Tc, S, 1)
        # chunk-wide A_bar / X_bar precompute (full-vreg VPU ops)
        abar_sc[...] = exp_a[None, None, :, :] * dlt_ch[:, :, None, :]
        hch_sc[...] = b_col * (dlt_ch * u_ch)[:, :, None, :]
        # carry-only recurrence over the chunk (unrolled Tc steps)
        for t in range(Tc):
            h = abar_sc[:, t, :, :] * h + hch_sc[:, t, :, :]
            hch_sc[:, t, :, :] = h
        # y for the whole chunk: one multiply + sublane reduce + one store
        y_sc[:, pl.ds(off, Tc), :] = jnp.sum(c_col * hch_sc[...], axis=2)
        return h

    h0 = jnp.zeros((BB, S, d_model), jnp.float32)
    lax.fori_loop(0, n_chunks, chunk_body, h0)

    # ---- hoisted skip term, gate, out_proj, residual ----
    u = u_sc[...]
    y = y_sc[...] + d_vec * u                            # (BB, L_pad, d_model)
    out2 = _mxu((y * _silu(g_sc[...])).reshape(M, d_model), wout_ref[0])
    out_ref[...] = out2.reshape(out_ref.shape) + out_ref[...]


# ---------------------------------------------------------------------------
# Wrapper: one pallas_call for the whole (num_layers-deep) model.
# ---------------------------------------------------------------------------
def mamba_forward(seq, packed, *, d_input, d_model, d_state, ker_size,
                  tc=8, bb=None):
    B, L, d_in = seq.shape
    assert d_in == d_input
    num_layers, d_in_pad, _ = packed["w_in"].shape
    d_discr_pad = packed["w_d2"].shape[1]

    Tc = tc
    L_pad = ((L + Tc - 1) // Tc) * Tc
    if bb is None:
        bb = min(B, 8)
    B_pad = ((B + bb - 1) // bb) * bb

    seq_p = jnp.zeros((B_pad, L_pad, d_in_pad), jnp.float32)
    seq_p = seq_p.at[:B, :L, :d_input].set(seq.astype(jnp.float32))

    kernel = functools.partial(
        mamba_fused_kernel, BB=bb, L_pad=L_pad, d_input=d_input,
        d_model=d_model, d_state=d_state, d_discr_pad=d_discr_pad,
        ker_size=ker_size, Tc=Tc)

    def _wspec(arr):
        tail = arr.shape[1:]
        nt = len(tail)
        return pl.BlockSpec((1,) + tail,
                            lambda b, l, _nt=nt: (l,) + (0,) * _nt)

    out = pl.pallas_call(
        kernel,
        out_shape=jax.ShapeDtypeStruct((B_pad, L_pad, d_in_pad), jnp.float32),
        grid=(B_pad // bb, num_layers),
        in_specs=[pl.BlockSpec((bb, L_pad, d_in_pad), lambda b, l: (b, 0, 0)),
                  _wspec(packed["w_rms"]),
                  _wspec(packed["smallp"]),
                  _wspec(packed["w_in"]),
                  _wspec(packed["w_du"]),
                  _wspec(packed["w_d2"]),
                  _wspec(packed["w_out"])],
        out_specs=pl.BlockSpec((bb, L_pad, d_in_pad), lambda b, l: (b, 0, 0)),
        scratch_shapes=[
            pltpu.VMEM((bb, L_pad, d_model), jnp.float32),       # u
            pltpu.VMEM((bb, L_pad, d_model), jnp.float32),       # delta
            pltpu.VMEM((bb, L_pad, d_model), jnp.float32),       # gate
            pltpu.VMEM((bb, L_pad, 2 * d_state), jnp.float32),   # B | C
            pltpu.VMEM((bb, L_pad, d_model), jnp.float32),       # y
            pltpu.VMEM((bb, Tc, d_state, d_model), jnp.float32),  # A_bar chunk
            pltpu.VMEM((bb, Tc, d_state, d_model), jnp.float32),  # X_bar / h
        ],
        compiler_params=pltpu.CompilerParams(
            dimension_semantics=("parallel", "arbitrary"),
            vmem_limit_bytes=48 * 1024 * 1024),
    )(seq_p, packed["w_rms"], packed["smallp"], packed["w_in"],
      packed["w_du"], packed["w_d2"], packed["w_out"])

    return out[:B, :L, :d_input]


# ---------------------------------------------------------------------------
# Deterministic parameter init (PyTorch-equivalent shapes), stacked per layer.
# Matmul weights are rounded through bf16 so kernel and reference agree.
# ---------------------------------------------------------------------------
def init_params(key, num_layers, d_input, d_model, d_state, d_discr, ker_size):
    def uni(k, shape, fan_in):
        bound = 1.0 / np.sqrt(fan_in)
        return jax.random.uniform(k, shape, jnp.float32, -bound, bound)

    def r16(w):
        return w.astype(jnp.bfloat16).astype(jnp.float32)

    per_layer = []
    for _ in range(num_layers):
        key, *ks = jax.random.split(key, 9)
        w_in_pt = uni(ks[0], (2 * d_model, d_input), d_input)
        w_out_pt = uni(ks[1], (d_input, d_model), d_model)
        w_b_pt = uni(ks[2], (d_state, d_model), d_model)
        w_c_pt = uni(ks[3], (d_state, d_model), d_model)
        w_d1_pt = uni(ks[4], (d_discr, d_model), d_model)
        w_d2_pt = uni(ks[5], (d_model, d_discr), d_discr)
        w_conv_pt = uni(ks[6], (d_model, 1, ker_size), ker_size)
        b_conv_pt = uni(ks[7], (d_model,), ker_size)
        A_pt = jnp.tile(jnp.arange(1, d_state + 1, dtype=jnp.float32),
                        (d_model, 1))                            # (dm, s)
        per_layer.append(dict(
            w_rms=jnp.ones((1, d_input), jnp.float32),
            w_in=r16(w_in_pt.T),                                 # (d_in, 2dm)
            w_conv=w_conv_pt.reshape(d_model, ker_size).T,       # (K, dm)
            b_conv=b_conv_pt.reshape(1, d_model),
            w_b=r16(w_b_pt.T),                                   # (dm, s)
            w_c=r16(w_c_pt.T),                                   # (dm, s)
            w_d1=r16(w_d1_pt.T),                                 # (dm, d_discr)
            w_d2=r16(w_d2_pt.T),                                 # (d_discr, dm)
            exp_a_t=jnp.exp(-A_pt).T,                            # (s, dm)
            d_vec=jnp.ones((1, d_model), jnp.float32),
            w_out=r16(w_out_pt.T),                               # (dm, d_in)
        ))
    return {k: jnp.stack([p[k] for p in per_layer], axis=0)
            for k in per_layer[0]}


# ---------------------------------------------------------------------------
# Pack / pad the logical params into the kernel's streamed layout
# (bf16 matmul weights, lane-padded d_input / d_discr, fused small params).
# ---------------------------------------------------------------------------
def pack_params(params, *, d_input, d_model, d_state, d_discr, ker_size):
    nl = params["w_in"].shape[0]
    d_in_pad = ((d_input + 127) // 128) * 128
    d_discr_pad = ((d_discr + 127) // 128) * 128
    K, S = ker_size, d_state

    w_rms = jnp.zeros((nl, 1, d_in_pad), jnp.float32
                      ).at[:, :, :d_input].set(params["w_rms"])

    smallp = jnp.zeros((nl, S + K + 2, d_model), jnp.float32)
    smallp = smallp.at[:, 0:S, :].set(params["exp_a_t"])
    smallp = smallp.at[:, S:S + K, :].set(params["w_conv"])
    smallp = smallp.at[:, S + K, :].set(params["b_conv"][:, 0, :])
    smallp = smallp.at[:, S + K + 1, :].set(params["d_vec"][:, 0, :])

    w_in = jnp.zeros((nl, d_in_pad, 2 * d_model), jnp.bfloat16
                     ).at[:, :d_input, :].set(params["w_in"].astype(jnp.bfloat16))

    w_du = jnp.zeros((nl, d_model, d_discr_pad + 2 * S), jnp.bfloat16)
    w_du = w_du.at[:, :, :d_discr].set(params["w_d1"].astype(jnp.bfloat16))
    w_du = w_du.at[:, :, d_discr_pad:d_discr_pad + S].set(
        params["w_b"].astype(jnp.bfloat16))
    w_du = w_du.at[:, :, d_discr_pad + S:].set(params["w_c"].astype(jnp.bfloat16))

    w_d2 = jnp.zeros((nl, d_discr_pad, d_model), jnp.bfloat16
                     ).at[:, :d_discr, :].set(params["w_d2"].astype(jnp.bfloat16))

    w_out = jnp.zeros((nl, d_model, d_in_pad), jnp.bfloat16
                      ).at[:, :, :d_input].set(params["w_out"].astype(jnp.bfloat16))

    return dict(w_rms=w_rms, smallp=smallp, w_in=w_in, w_du=w_du,
                w_d2=w_d2, w_out=w_out)


# ---------------------------------------------------------------------------
# Pure-JAX reference (mirrors the PyTorch forward exactly) for verification.
# ---------------------------------------------------------------------------
def mamba_ref(seq, params, *, d_model, d_state, ker_size):
    PREC = lax.Precision.HIGHEST
    num_layers = params["w_in"].shape[0]
    for li in range(num_layers):
        p = {k: v[li] for k, v in params.items()}
        x = seq
        B, L, _ = x.shape
        ms = jnp.mean(x * x, axis=-1, keepdims=True)
        xn = x * lax.rsqrt(ms + RMS_EPS) * p["w_rms"][0]
        proj = jnp.einsum('bld,de->ble', xn, p["w_in"], precision=PREC)
        a, g = proj[..., :d_model], proj[..., d_model:]
        conv = jnp.zeros_like(a)
        for k in range(ker_size):
            sh = ker_size - 1 - k
            a_sh = a if sh == 0 else jnp.concatenate(
                [jnp.zeros((B, sh, d_model), jnp.float32), a[:, :L - sh, :]],
                axis=1)
            conv = conv + a_sh * p["w_conv"][k]
        conv = conv + p["b_conv"][0]
        u = conv * jax.nn.sigmoid(conv)
        Bm = jnp.einsum('bld,ds->bls', u, p["w_b"], precision=PREC)
        Cm = jnp.einsum('bld,ds->bls', u, p["w_c"], precision=PREC)
        dlt = jax.nn.softplus(
            p["d_vec"][0]
            + jnp.einsum('blk,kd->bld',
                         jnp.einsum('bld,dk->blk', u, p["w_d1"],
                                    precision=PREC),
                         p["w_d2"], precision=PREC))
        expA = p["exp_a_t"].T                                    # (dm, s)
        A_bar = expA[None, None] * dlt[..., None]                # (B,L,dm,s)
        X_bar = Bm[:, :, None, :] * dlt[..., None] * u[..., None]
        h = jnp.zeros((B, d_model, d_state), jnp.float32)
        hs = []
        for t in range(L):
            h = A_bar[:, t] * h + X_bar[:, t]
            hs.append(h)
        hid = jnp.stack(hs, axis=1)                              # (B,L,dm,s)
        y = jnp.einsum('blds,bls->bld', hid, Cm, precision=PREC) \
            + p["d_vec"][0] * u
        out = jnp.einsum('bld,de->ble', y * (g * jax.nn.sigmoid(g)),
                         p["w_out"], precision=PREC)
        seq = out + x
    return seq


if __name__ == "__main__":
    num_layers, d_input, d_model, d_state, ker_size = 2, 16, 128, 16, 4
    d_discr = d_model // 16
    B, L = 2, 16

    key = jax.random.PRNGKey(0)
    key, k_seq = jax.random.split(key)
    seq = jax.random.normal(k_seq, (B, L, d_input), jnp.float32)
    params = init_params(key, num_layers, d_input, d_model, d_state,
                         d_discr, ker_size)
    packed = pack_params(params, d_input=d_input, d_model=d_model,
                         d_state=d_state, d_discr=d_discr, ker_size=ker_size)

    out = mamba_forward(seq, packed, d_input=d_input, d_model=d_model,
                        d_state=d_state, ker_size=ker_size)
    out = jax.block_until_ready(out)

    ref = jax.block_until_ready(
        mamba_ref(seq, params, d_model=d_model, d_state=d_state,
                  ker_size=ker_size))

    assert out.shape == (B, L, d_input)
    np.testing.assert_allclose(np.asarray(out), np.asarray(ref),
                               rtol=2e-2, atol=2e-2)
    print("KERNEL_OK")
</pallas_src>

<mosaic_0001>
module attributes {stable_mosaic.version = 11 : i64} {
  func.func @mamba_fused_kernel(%arg0: i32, %arg1: i32, %arg2: memref<2x16x128xf32, #tpu.memory_space<vmem>>, %arg3: memref<1x1x128xf32, #tpu.memory_space<vmem>>, %arg4: memref<1x22x128xf32, #tpu.memory_space<vmem>>, %arg5: memref<1x128x256xbf16, #tpu.memory_space<vmem>>, %arg6: memref<1x128x160xbf16, #tpu.memory_space<vmem>>, %arg7: memref<1x128x128xbf16, #tpu.memory_space<vmem>>, %arg8: memref<1x128x128xbf16, #tpu.memory_space<vmem>>, %arg9: memref<2x16x128xf32, #tpu.memory_space<vmem>>, %arg10: memref<2x16x128xf32, #tpu.memory_space<vmem>>, %arg11: memref<2x16x128xf32, #tpu.memory_space<vmem>>, %arg12: memref<2x16x128xf32, #tpu.memory_space<vmem>>, %arg13: memref<2x16x32xf32, #tpu.memory_space<vmem>>, %arg14: memref<2x16x128xf32, #tpu.memory_space<vmem>>, %arg15: memref<2x8x16x128xf32, #tpu.memory_space<vmem>>, %arg16: memref<2x8x16x128xf32, #tpu.memory_space<vmem>>) attributes {dimension_semantics = [#tpu.dimension_semantics<parallel>, #tpu.dimension_semantics<arbitrary>], iteration_bounds = array<i64: 1, 2>, scalar_prefetch = 0 : i64, scratch_operands = 7 : i64, tpu.core_type = #tpu.core_type<tc>, window_params = [{transform_indices = @transform_0, window_bounds = array<i64: 2, 16, 128>}, {transform_indices = @transform_1, window_bounds = array<i64: 1, 1, 128>}, {transform_indices = @transform_2, window_bounds = array<i64: 1, 22, 128>}, {transform_indices = @transform_3, window_bounds = array<i64: 1, 128, 256>}, {transform_indices = @transform_4, window_bounds = array<i64: 1, 128, 160>}, {transform_indices = @transform_5, window_bounds = array<i64: 1, 128, 128>}, {transform_indices = @transform_6, window_bounds = array<i64: 1, 128, 128>}, {transform_indices = @transform_7, window_bounds = array<i64: 2, 16, 128>}]} {
    %c0_i32 = arith.constant 0 : i32
    %0 = arith.cmpi eq, %arg1, %c0_i32 : i32
    %1 = arith.extui %0 : i1 to i32
    %c0_i32_0 = arith.constant 0 : i32
    %2 = arith.cmpi ne, %1, %c0_i32_0 : i32
    scf.if %2 {
      %c0_84 = arith.constant 0 : index
      %c0_85 = arith.constant 0 : index
      %c0_86 = arith.constant 0 : index
      %139 = vector.load %arg2[%c0_84, %c0_85, %c0_86] : memref<2x16x128xf32, #tpu.memory_space<vmem>>, vector<2x16x128xf32>
      %c0_87 = arith.constant 0 : index
      %c0_88 = arith.constant 0 : index
      %c0_89 = arith.constant 0 : index
      %140 = vector.load %arg9[%c0_87, %c0_88, %c0_89] : memref<2x16x128xf32, #tpu.memory_space<vmem>>, vector<2x16x128xf32>
      tpu.vector_store %arg9[%c0_87, %c0_88, %c0_89], %139 {strides = array<i32>} : memref<2x16x128xf32, #tpu.memory_space<vmem>>, vector<2x16x128xf32>,
    } else {
    }
    %c0 = arith.constant 0 : index
    %c0_1 = arith.constant 0 : index
    %c0_2 = arith.constant 0 : index
    %3 = vector.load %arg9[%c0, %c0_1, %c0_2] : memref<2x16x128xf32, #tpu.memory_space<vmem>>, vector<2x16x128xf32>
    %4 = arith.mulf %3, %3 : vector<2x16x128xf32>
    %cst = arith.constant dense<0.000000e+00> : vector<2x16xf32>
    %5 = vector.multi_reduction <add>, %4, %cst [2] : vector<2x16x128xf32> to vector<2x16xf32>
    %6 = vector.shape_cast %5 : vector<2x16xf32> to vector<2x16x1xf32>
    %cst_3 = arith.constant 6.250000e-02 : f32
    %7 = vector.broadcast %cst_3 : f32 to vector<2x16x1xf32>
    %8 = arith.mulf %6, %7 : vector<2x16x1xf32>
    %cst_4 = arith.constant 9.99999997E-7 : f32
    %9 = vector.broadcast %cst_4 : f32 to vector<2x16x1xf32>
    %10 = arith.addf %8, %9 : vector<2x16x1xf32>
    %11 = math.rsqrt %10 : vector<2x16x1xf32>
    %12 = vector.broadcast %11 : vector<2x16x1xf32> to vector<2x16x128xf32>
    %13 = arith.mulf %3, %12 : vector<2x16x128xf32>
    %c0_5 = arith.constant 0 : index
    %c0_6 = arith.constant 0 : index
    %c0_7 = arith.constant 0 : index
    %14 = vector.load %arg3[%c0_5, %c0_6, %c0_7] : memref<1x1x128xf32, #tpu.memory_space<vmem>>, vector<1x1x128xf32>
    %15 = vector.shape_cast %14 : vector<1x1x128xf32> to vector<1x128xf32>
    %16 = vector.shape_cast %15 : vector<1x128xf32> to vector<1x1x128xf32>
    %17 = vector.broadcast %16 : vector<1x1x128xf32> to vector<2x16x128xf32>
    %18 = arith.mulf %13, %17 : vector<2x16x128xf32>
    %19 = vector.shape_cast %18 : vector<2x16x128xf32> to vector<32x128xf32>
    %c0_8 = arith.constant 0 : index
    %c0_9 = arith.constant 0 : index
    %c0_10 = arith.constant 0 : index
    %20 = vector.load %arg5[%c0_8, %c0_9, %c0_10] : memref<1x128x256xbf16, #tpu.memory_space<vmem>>, vector<1x128x256xbf16>
    %21 = vector.shape_cast %20 : vector<1x128x256xbf16> to vector<128x256xbf16>
    %22 = arith.truncf %19 : vector<32x128xf32> to vector<32x128xbf16>
    %cst_11 = arith.constant dense<0.000000e+00> : vector<32x256xf32>
    %23 = tpu.matmul %22, %21, %cst_11 {dimension_numbers = #tpu.dot_dimension_numbers<[1], [0], [0], [1], [0, 0, 1, 1], [], []>} : vector<32x128xbf16>, vector<128x256xbf16>, vector<32x256xf32> -> vector<32x256xf32>
    %24 = vector.extract_strided_slice %23 {offsets = [0, 0], sizes = [32, 128], strides = [1, 1]} : vector<32x256xf32> to vector<32x128xf32>
    %25 = vector.extract_strided_slice %23 {offsets = [0, 128], sizes = [32, 128], strides = [1, 1]} : vector<32x256xf32> to vector<32x128xf32>
    %26 = vector.shape_cast %25 : vector<32x128xf32> to vector<2x16x128xf32>
    %c0_12 = arith.constant 0 : index
    %c0_13 = arith.constant 0 : index
    %c0_14 = arith.constant 0 : index
    %27 = vector.load %arg12[%c0_12, %c0_13, %c0_14] : memref<2x16x128xf32, #tpu.memory_space<vmem>>, vector<2x16x128xf32>
    tpu.vector_store %arg12[%c0_12, %c0_13, %c0_14], %26 {strides = array<i32>} : memref<2x16x128xf32, #tpu.memory_space<vmem>>, vector<2x16x128xf32>,
    %28 = tpu.iota {dimensions = array<i32: 1>} : vector<2x16x128xi32>
    %29 = vector.shape_cast %28 : vector<2x16x128xi32> to vector<32x128xi32>
    %c0_15 = arith.constant 0 : index
    %c19 = arith.constant 19 : index
    %c0_16 = arith.constant 0 : index
    %30 = vector.load %arg4[%c0_15, %c19, %c0_16] : memref<1x22x128xf32, #tpu.memory_space<vmem>>, vector<1x1x128xf32>
    %31 = vector.shape_cast %30 : vector<1x1x128xf32> to vector<1x128xf32>
    %32 = vector.broadcast %31 : vector<1x128xf32> to vector<32x128xf32>
    %33 = arith.mulf %24, %32 : vector<32x128xf32>
    %c3_i32 = arith.constant 3 : i32
    %34 = tpu.dynamic_rotate %24 by %c3_i32 dim 0 : vector<32x128xf32>, i32 -> vector<32x128xf32>
    %c3_i32_17 = arith.constant 3 : i32
    %35 = vector.broadcast %c3_i32_17 : i32 to vector<32x128xi32>
    %36 = arith.cmpi slt, %29, %35 : vector<32x128xi32>
    %cst_18 = arith.constant 0.000000e+00 : f32
    %37 = vector.broadcast %cst_18 : f32 to vector<32x128xf32>
    %38 = arith.select %36, %37, %34 : vector<32x128xi1>, vector<32x128xf32>
    %c0_19 = arith.constant 0 : index
    %c16 = arith.constant 16 : index
    %c0_20 = arith.constant 0 : index
    %39 = vector.load %arg4[%c0_19, %c16, %c0_20] : memref<1x22x128xf32, #tpu.memory_space<vmem>>, vector<1x1x128xf32>
    %40 = vector.shape_cast %39 : vector<1x1x128xf32> to vector<1x128xf32>
    %41 = vector.broadcast %40 : vector<1x128xf32> to vector<32x128xf32>
    %42 = arith.mulf %38, %41 : vector<32x128xf32>
    %43 = arith.addf %33, %42 : vector<32x128xf32>
    %c2_i32 = arith.constant 2 : i32
    %44 = tpu.dynamic_rotate %24 by %c2_i32 dim 0 : vector<32x128xf32>, i32 -> vector<32x128xf32>
    %c2_i32_21 = arith.constant 2 : i32
    %45 = vector.broadcast %c2_i32_21 : i32 to vector<32x128xi32>
    %46 = arith.cmpi slt, %29, %45 : vector<32x128xi32>
    %cst_22 = arith.constant 0.000000e+00 : f32
    %47 = vector.broadcast %cst_22 : f32 to vector<32x128xf32>
    %48 = arith.select %46, %47, %44 : vector<32x128xi1>, vector<32x128xf32>
    %c0_23 = arith.constant 0 : index
    %c17 = arith.constant 17 : index
    %c0_24 = arith.constant 0 : index
    %49 = vector.load %arg4[%c0_23, %c17, %c0_24] : memref<1x22x128xf32, #tpu.memory_space<vmem>>, vector<1x1x128xf32>
    %50 = vector.shape_cast %49 : vector<1x1x128xf32> to vector<1x128xf32>
    %51 = vector.broadcast %50 : vector<1x128xf32> to vector<32x128xf32>
    %52 = arith.mulf %48, %51 : vector<32x128xf32>
    %53 = arith.addf %43, %52 : vector<32x128xf32>
    %c1_i32 = arith.constant 1 : i32
    %54 = tpu.dynamic_rotate %24 by %c1_i32 dim 0 : vector<32x128xf32>, i32 -> vector<32x128xf32>
    %c1_i32_25 = arith.constant 1 : i32
    %55 = vector.broadcast %c1_i32_25 : i32 to vector<32x128xi32>
    %56 = arith.cmpi slt, %29, %55 : vector<32x128xi32>
    %cst_26 = arith.constant 0.000000e+00 : f32
    %57 = vector.broadcast %cst_26 : f32 to vector<32x128xf32>
    %58 = arith.select %56, %57, %54 : vector<32x128xi1>, vector<32x128xf32>
    %c0_27 = arith.constant 0 : index
    %c18 = arith.constant 18 : index
    %c0_28 = arith.constant 0 : index
    %59 = vector.load %arg4[%c0_27, %c18, %c0_28] : memref<1x22x128xf32, #tpu.memory_space<vmem>>, vector<1x1x128xf32>
    %60 = vector.shape_cast %59 : vector<1x1x128xf32> to vector<1x128xf32>
    %61 = vector.broadcast %60 : vector<1x128xf32> to vector<32x128xf32>
    %62 = arith.mulf %58, %61 : vector<32x128xf32>
    %63 = arith.addf %53, %62 : vector<32x128xf32>
    %c0_29 = arith.constant 0 : index
    %c20 = arith.constant 20 : index
    %c0_30 = arith.constant 0 : index
    %64 = vector.load %arg4[%c0_29, %c20, %c0_30] : memref<1x22x128xf32, #tpu.memory_space<vmem>>, vector<1x1x128xf32>
    %65 = vector.shape_cast %64 : vector<1x1x128xf32> to vector<1x128xf32>
    %66 = vector.broadcast %65 : vector<1x128xf32> to vector<32x128xf32>
    %67 = arith.addf %63, %66 : vector<32x128xf32>
    %cst_31 = arith.constant 0.000000e+00 : f32
    %68 = vector.broadcast %cst_31 : f32 to vector<32x128xf32>
    %69 = arith.subf %68, %67 : vector<32x128xf32>
    %70 = math.exp %69 : vector<32x128xf32>
    %cst_32 = arith.constant 1.000000e+00 : f32
    %71 = vector.broadcast %cst_32 : f32 to vector<32x128xf32>
    %72 = arith.addf %71, %70 : vector<32x128xf32>
    %73 = tpu.reciprocal %72 {approx = true} : vector<32x128xf32> -> vector<32x128xf32>
    %74 = arith.mulf %67, %73 : vector<32x128xf32>
    %75 = vector.shape_cast %74 : vector<32x128xf32> to vector<2x16x128xf32>
    %c0_33 = arith.constant 0 : index
    %c0_34 = arith.constant 0 : index
    %c0_35 = arith.constant 0 : index
    %76 = vector.load %arg10[%c0_33, %c0_34, %c0_35] : memref<2x16x128xf32, #tpu.memory_space<vmem>>, vector<2x16x128xf32>
    tpu.vector_store %arg10[%c0_33, %c0_34, %c0_35], %75 {strides = array<i32>} : memref<2x16x128xf32, #tpu.memory_space<vmem>>, vector<2x16x128xf32>,
    %c0_36 = arith.constant 0 : index
    %c0_37 = arith.constant 0 : index
    %c0_38 = arith.constant 0 : index
    %77 = vector.load %arg6[%c0_36, %c0_37, %c0_38] : memref<1x128x160xbf16, #tpu.memory_space<vmem>>, vector<1x128x160xbf16>
    %78 = vector.shape_cast %77 : vector<1x128x160xbf16> to vector<128x160xbf16>
    %79 = arith.truncf %74 : vector<32x128xf32> to vector<32x128xbf16>
    %cst_39 = arith.constant dense<0.000000e+00> : vector<32x160xf32>
    %80 = tpu.matmul %79, %78, %cst_39 {dimension_numbers = #tpu.dot_dimension_numbers<[1], [0], [0], [1], [0, 0, 1, 1], [], []>} : vector<32x128xbf16>, vector<128x160xbf16>, vector<32x160xf32> -> vector<32x160xf32>
    %81 = vector.extract_strided_slice %80 {offsets = [0, 128], sizes = [32, 32], strides = [1, 1]} : vector<32x160xf32> to vector<32x32xf32>
    %82 = vector.shape_cast %81 : vector<32x32xf32> to vector<2x16x32xf32>
    %c0_40 = arith.constant 0 : index
    %c0_41 = arith.constant 0 : index
    %c0_42 = arith.constant 0 : index
    %83 = vector.load %arg13[%c0_40, %c0_41, %c0_42] : memref<2x16x32xf32, #tpu.memory_space<vmem>>, vector<2x16x32xf32>
    tpu.vector_store %arg13[%c0_40, %c0_41, %c0_42], %82 {strides = array<i32>} : memref<2x16x32xf32, #tpu.memory_space<vmem>>, vector<2x16x32xf32>,
    %84 = vector.extract_strided_slice %80 {offsets = [0, 0], sizes = [32, 128], strides = [1, 1]} : vector<32x160xf32> to vector<32x128xf32>
    %c0_43 = arith.constant 0 : index
    %c0_44 = arith.constant 0 : index
    %c0_45 = arith.constant 0 : index
    %85 = vector.load %arg7[%c0_43, %c0_44, %c0_45] : memref<1x128x128xbf16, #tpu.memory_space<vmem>>, vector<1x128x128xbf16>
    %86 = vector.shape_cast %85 : vector<1x128x128xbf16> to vector<128x128xbf16>
    %87 = arith.truncf %84 : vector<32x128xf32> to vector<32x128xbf16>
    %cst_46 = arith.constant dense<0.000000e+00> : vector<32x128xf32>
    %88 = tpu.matmul %87, %86, %cst_46 {dimension_numbers = #tpu.dot_dimension_numbers<[1], [0], [0], [1], [0, 0, 1, 1], [], []>} : vector<32x128xbf16>, vector<128x128xbf16>, vector<32x128xf32> -> vector<32x128xf32>
    %c0_47 = arith.constant 0 : index
    %c21 = arith.constant 21 : index
    %c0_48 = arith.constant 0 : index
    %89 = vector.load %arg4[%c0_47, %c21, %c0_48] : memref<1x22x128xf32, #tpu.memory_space<vmem>>, vector<1x1x128xf32>
    %90 = vector.shape_cast %89 : vector<1x1x128xf32> to vector<1x128xf32>
    %91 = vector.broadcast %90 : vector<1x128xf32> to vector<32x128xf32>
    %92 = arith.addf %91, %88 : vector<32x128xf32>
    %cst_49 = arith.constant 0.000000e+00 : f32
    %93 = vector.broadcast %cst_49 : f32 to vector<32x128xf32>
    %94 = arith.maximumf %92, %93 : vector<32x128xf32>
    %95 = math.absf %92 : vector<32x128xf32>
    %cst_50 = arith.constant 0.000000e+00 : f32
    %96 = vector.broadcast %cst_50 : f32 to vector<32x128xf32>
    %97 = arith.subf %96, %95 : vector<32x128xf32>
    %98 = math.exp %97 : vector<32x128xf32>
    %cst_51 = arith.constant 1.000000e+00 : f32
    %99 = vector.broadcast %cst_51 : f32 to vector<32x128xf32>
    %100 = arith.addf %99, %98 : vector<32x128xf32>
    %101 = math.log %100 : vector<32x128xf32>
    %102 = arith.addf %94, %101 : vector<32x128xf32>
    %103 = vector.shape_cast %102 : vector<32x128xf32> to vector<2x16x128xf32>
    %c0_52 = arith.constant 0 : index
    %c0_53 = arith.constant 0 : index
    %c0_54 = arith.constant 0 : index
    %104 = vector.load %arg11[%c0_52, %c0_53, %c0_54] : memref<2x16x128xf32, #tpu.memory_space<vmem>>, vector<2x16x128xf32>
    tpu.vector_store %arg11[%c0_52, %c0_53, %c0_54], %103 {strides = array<i32>} : memref<2x16x128xf32, #tpu.memory_space<vmem>>, vector<2x16x128xf32>,
    %c0_55 = arith.constant 0 : index
    %c0_56 = arith.constant 0 : index
    %c0_57 = arith.constant 0 : index
    %105 = vector.load %arg4[%c0_55, %c0_56, %c0_57] : memref<1x22x128xf32, #tpu.memory_space<vmem>>, vector<1x16x128xf32>
    %106 = vector.shape_cast %105 : vector<1x16x128xf32> to vector<16x128xf32>
    %107 = tpu.iota {dimensions = array<i32: 0>} : vector<16x16xi32>
    %108 = tpu.iota {dimensions = array<i32: 1>} : vector<16x16xi32>
    %109 = arith.cmpi eq, %107, %108 : vector<16x16xi32>
    %110 = arith.extui %109 : vector<16x16xi1> to vector<16x16xi32>
    %111 = arith.sitofp %110 : vector<16x16xi32> to vector<16x16xf32>
    %cst_58 = arith.constant 0.000000e+00 : f32
    %112 = vector.broadcast %cst_58 : f32 to vector<2x16x128xf32>
    %c0_i32_59 = arith.constant 0 : i32
    %c2_i32_60 = arith.constant 2 : i32
    %113 = arith.addi %c0_i32_59, %c2_i32_60 : i32
    %c1_i32_61 = arith.constant 1 : i32
    %114 = scf.for %arg17 = %c0_i32_59 to %113 step %c1_i32_61 iter_args(%arg18 = %112) -> (vector<2x16x128xf32>)  : i32 {
      %c8_i32 = arith.constant 8 : i32
      %139 = arith.muli %arg17, %c8_i32 : i32
      %140 = tpu.assume_multiple %139, 8 : i32
      %c0_84 = arith.constant 0 : index
      %141 = arith.index_cast %140 : i32 to index
      %c0_85 = arith.constant 0 : index
      %142 = vector.load %arg11[%c0_84, %141, %c0_85] : memref<2x16x128xf32, #tpu.memory_space<vmem>>, vector<2x8x128xf32>
      %c0_86 = arith.constant 0 : index
      %143 = arith.index_cast %140 : i32 to index
      %c0_87 = arith.constant 0 : index
      %144 = vector.load %arg10[%c0_86, %143, %c0_87] : memref<2x16x128xf32, #tpu.memory_space<vmem>>, vector<2x8x128xf32>
      %c0_88 = arith.constant 0 : index
      %145 = arith.index_cast %140 : i32 to index
      %c0_89 = arith.constant 0 : index
      %146 = vector.load %arg13[%c0_88, %145, %c0_89] : memref<2x16x32xf32, #tpu.memory_space<vmem>>, vector<2x8x32xf32>
      %147 = vector.extract_strided_slice %146 {offsets = [0, 0, 0], sizes = [2, 8, 16], strides = [1, 1, 1]} : vector<2x8x32xf32> to vector<2x8x16xf32>
      %148 = vector.shape_cast %147 : vector<2x8x16xf32> to vector<2x8x1x16xf32>
      %149 = vector.shape_cast %111 : vector<16x16xf32> to vector<1x1x16x16xf32>
      %150 = vector.broadcast %148 : vector<2x8x1x16xf32> to vector<2x8x16x16xf32>
      %151 = vector.broadcast %149 : vector<1x1x16x16xf32> to vector<2x8x16x16xf32>
      %152 = arith.mulf %150, %151 : vector<2x8x16x16xf32>
      %cst_90 = arith.constant dense<0.000000e+00> : vector<2x8x16xf32>
      %153 = vector.multi_reduction <add>, %152, %cst_90 [3] : vector<2x8x16x16xf32> to vector<2x8x16xf32>
      %154 = vector.shape_cast %153 : vector<2x8x16xf32> to vector<2x8x16x1xf32>
      %155 = vector.extract_strided_slice %146 {offsets = [0, 0, 16], sizes = [2, 8, 16], strides = [1, 1, 1]} : vector<2x8x32xf32> to vector<2x8x16xf32>
      %156 = vector.shape_cast %155 : vector<2x8x16xf32> to vector<2x8x1x16xf32>
      %157 = vector.shape_cast %111 : vector<16x16xf32> to vector<1x1x16x16xf32>
      %158 = vector.broadcast %156 : vector<2x8x1x16xf32> to vector<2x8x16x16xf32>
      %159 = vector.broadcast %157 : vector<1x1x16x16xf32> to vector<2x8x16x16xf32>
      %160 = arith.mulf %158, %159 : vector<2x8x16x16xf32>
      %cst_91 = arith.constant dense<0.000000e+00> : vector<2x8x16xf32>
      %161 = vector.multi_reduction <add>, %160, %cst_91 [3] : vector<2x8x16x16xf32> to vector<2x8x16xf32>
      %162 = vector.shape_cast %161 : vector<2x8x16xf32> to vector<2x8x16x1xf32>
      %163 = vector.shape_cast %106 : vector<16x128xf32> to vector<1x1x16x128xf32>
      %164 = vector.shape_cast %142 : vector<2x8x128xf32> to vector<2x8x1x128xf32>
      %165 = vector.broadcast %163 : vector<1x1x16x128xf32> to vector<2x8x16x128xf32>
      %166 = vector.broadcast %164 : vector<2x8x1x128xf32> to vector<2x8x16x128xf32>
      %167 = arith.mulf %165, %166 : vector<2x8x16x128xf32>
      %c0_92 = arith.constant 0 : index
      %c0_93 = arith.constant 0 : index
      %c0_94 = arith.constant 0 : index
      %c0_95 = arith.constant 0 : index
      %168 = vector.load %arg15[%c0_92, %c0_93, %c0_94, %c0_95] : memref<2x8x16x128xf32, #tpu.memory_space<vmem>>, vector<2x8x16x128xf32>
      tpu.vector_store %arg15[%c0_92, %c0_93, %c0_94, %c0_95], %167 {strides = array<i32>} : memref<2x8x16x128xf32, #tpu.memory_space<vmem>>, vector<2x8x16x128xf32>,
      %169 = arith.mulf %142, %144 : vector<2x8x128xf32>
      %170 = vector.shape_cast %169 : vector<2x8x128xf32> to vector<2x8x1x128xf32>
      %171 = vector.broadcast %154 : vector<2x8x16x1xf32> to vector<2x8x16x128xf32>
      %172 = vector.broadcast %170 : vector<2x8x1x128xf32> to vector<2x8x16x128xf32>
      %173 = arith.mulf %171, %172 : vector<2x8x16x128xf32>
      %c0_96 = arith.constant 0 : index
      %c0_97 = arith.constant 0 : index
      %c0_98 = arith.constant 0 : index
      %c0_99 = arith.constant 0 : index
      %174 = vector.load %arg16[%c0_96, %c0_97, %c0_98, %c0_99] : memref<2x8x16x128xf32, #tpu.memory_space<vmem>>, vector<2x8x16x128xf32>
      tpu.vector_store %arg16[%c0_96, %c0_97, %c0_98, %c0_99], %173 {strides = array<i32>} : memref<2x8x16x128xf32, #tpu.memory_space<vmem>>, vector<2x8x16x128xf32>,
      %c0_100 = arith.constant 0 : index
      %c0_101 = arith.constant 0 : index
      %c0_102 = arith.constant 0 : index
      %c0_103 = arith.constant 0 : index
      %175 = vector.load %arg15[%c0_100, %c0_101, %c0_102, %c0_103] : memref<2x8x16x128xf32, #tpu.memory_space<vmem>>, vector<2x1x16x128xf32>
      %176 = vector.shape_cast %175 : vector<2x1x16x128xf32> to vector<2x16x128xf32>
      %177 = arith.mulf %176, %arg18 : vector<2x16x128xf32>
      %c0_104 = arith.constant 0 : index
      %c0_105 = arith.constant 0 : index
      %c0_106 = arith.constant 0 : index
      %c0_107 = arith.constant 0 : index
      %178 = vector.load %arg16[%c0_104, %c0_105, %c0_106, %c0_107] : memref<2x8x16x128xf32, #tpu.memory_space<vmem>>, vector<2x1x16x128xf32>
      %179 = vector.shape_cast %178 : vector<2x1x16x128xf32> to vector<2x16x128xf32>
      %180 = arith.addf %177, %179 : vector<2x16x128xf32>
      %c0_108 = arith.constant 0 : index
      %c0_109 = arith.constant 0 : index
      %c0_110 = arith.constant 0 : index
      %c0_111 = arith.constant 0 : index
      %181 = vector.load %arg16[%c0_108, %c0_109, %c0_110, %c0_111] : memref<2x8x16x128xf32, #tpu.memory_space<vmem>>, vector<2x1x16x128xf32>
      %182 = vector.shape_cast %181 : vector<2x1x16x128xf32> to vector<2x16x128xf32>
      %183 = vector.shape_cast %180 : vector<2x16x128xf32> to vector<2x1x16x128xf32>
      tpu.vector_store %arg16[%c0_108, %c0_109, %c0_110, %c0_111], %183 {strides = array<i32>} : memref<2x8x16x128xf32, #tpu.memory_space<vmem>>, vector<2x1x16x128xf32>,
      %c0_112 = arith.constant 0 : index
      %c1 = arith.constant 1 : index
      %c0_113 = arith.constant 0 : index
      %c0_114 = arith.constant 0 : index
      %184 = vector.load %arg15[%c0_112, %c1, %c0_113, %c0_114] : memref<2x8x16x128xf32, #tpu.memory_space<vmem>>, vector<2x1x16x128xf32>
      %185 = vector.shape_cast %184 : vector<2x1x16x128xf32> to vector<2x16x128xf32>
      %186 = arith.mulf %185, %180 : vector<2x16x128xf32>
      %c0_115 = arith.constant 0 : index
      %c1_116 = arith.constant 1 : index
      %c0_117 = arith.constant 0 : index
      %c0_118 = arith.constant 0 : index
      %187 = vector.load %arg16[%c0_115, %c1_116, %c0_117, %c0_118] : memref<2x8x16x128xf32, #tpu.memory_space<vmem>>, vector<2x1x16x128xf32>
      %188 = vector.shape_cast %187 : vector<2x1x16x128xf32> to vector<2x16x128xf32>
      %189 = arith.addf %186, %188 : vector<2x16x128xf32>
      %c0_119 = arith.constant 0 : index
      %c1_120 = arith.constant 1 : index
      %c0_121 = arith.constant 0 : index
      %c0_122 = arith.constant 0 : index
      %190 = vector.load %arg16[%c0_119, %c1_120, %c0_121, %c0_122] : memref<2x8x16x128xf32, #tpu.memory_space<vmem>>, vector<2x1x16x128xf32>
      %191 = vector.shape_cast %190 : vector<2x1x16x128xf32> to vector<2x16x128xf32>
      %192 = vector.shape_cast %189 : vector<2x16x128xf32> to vector<2x1x16x128xf32>
      tpu.vector_store %arg16[%c0_119, %c1_120, %c0_121, %c0_122], %192 {strides = array<i32>} : memref<2x8x16x128xf32, #tpu.memory_space<vmem>>, vector<2x1x16x128xf32>,
      %c0_123 = arith.constant 0 : index
      %c2 = arith.constant 2 : index
      %c0_124 = arith.constant 0 : index
      %c0_125 = arith.constant 0 : index
      %193 = vector.load %arg15[%c0_123, %c2, %c0_124, %c0_125] : memref<2x8x16x128xf32, #tpu.memory_space<vmem>>, vector<2x1x16x128xf32>
      %194 = vector.shape_cast %193 : vector<2x1x16x128xf32> to vector<2x16x128xf32>
      %195 = arith.mulf %194, %189 : vector<2x16x128xf32>
      %c0_126 = arith.constant 0 : index
      %c2_127 = arith.constant 2 : index
      %c0_128 = arith.constant 0 : index
      %c0_129 = arith.constant 0 : index
      %196 = vector.load %arg16[%c0_126, %c2_127, %c0_128, %c0_129] : memref<2x8x16x128xf32, #tpu.memory_space<vmem>>, vector<2x1x16x128xf32>
      %197 = vector.shape_cast %196 : vector<2x1x16x128xf32> to vector<2x16x128xf32>
      %198 = arith.addf %195, %197 : vector<2x16x128xf32>
      %c0_130 = arith.constant 0 : index
      %c2_131 = arith.constant 2 : index
      %c0_132 = arith.constant 0 : index
      %c0_133 = arith.constant 0 : index
      %199 = vector.load %arg16[%c0_130, %c2_131, %c0_132, %c0_133] : memref<2x8x16x128xf32, #tpu.memory_space<vmem>>, vector<2x1x16x128xf32>
      %200 = vector.shape_cast %199 : vector<2x1x16x128xf32> to vector<2x16x128xf32>
      %201 = vector.shape_cast %198 : vector<2x16x128xf32> to vector<2x1x16x128xf32>
      tpu.vector_store %arg16[%c0_130, %c2_131, %c0_132, %c0_133], %201 {strides = array<i32>} : memref<2x8x16x128xf32, #tpu.memory_space<vmem>>, vector<2x1x16x128xf32>,
      %c0_134 = arith.constant 0 : index
      %c3 = arith.constant 3 : index
      %c0_135 = arith.constant 0 : index
      %c0_136 = arith.constant 0 : index
      %202 = vector.load %arg15[%c0_134, %c3, %c0_135, %c0_136] : memref<2x8x16x128xf32, #tpu.memory_space<vmem>>, vector<2x1x16x128xf32>
      %203 = vector.shape_cast %202 : vector<2x1x16x128xf32> to vector<2x16x128xf32>
      %204 = arith.mulf %203, %198 : vector<2x16x128xf32>
      %c0_137 = arith.constant 0 : index
      %c3_138 = arith.constant 3 : index
      %c0_139 = arith.constant 0 : index
      %c0_140 = arith.constant 0 : index
      %205 = vector.load %arg16[%c0_137, %c3_138, %c0_139, %c0_140] : memref<2x8x16x128xf32, #tpu.memory_space<vmem>>, vector<2x1x16x128xf32>
      %206 = vector.shape_cast %205 : vector<2x1x16x128xf32> to vector<2x16x128xf32>
      %207 = arith.addf %204, %206 : vector<2x16x128xf32>
      %c0_141 = arith.constant 0 : index
      %c3_142 = arith.constant 3 : index
      %c0_143 = arith.constant 0 : index
      %c0_144 = arith.constant 0 : index
      %208 = vector.load %arg16[%c0_141, %c3_142, %c0_143, %c0_144] : memref<2x8x16x128xf32, #tpu.memory_space<vmem>>, vector<2x1x16x128xf32>
      %209 = vector.shape_cast %208 : vector<2x1x16x128xf32> to vector<2x16x128xf32>
      %210 = vector.shape_cast %207 : vector<2x16x128xf32> to vector<2x1x16x128xf32>
      tpu.vector_store %arg16[%c0_141, %c3_142, %c0_143, %c0_144], %210 {strides = array<i32>} : memref<2x8x16x128xf32, #tpu.memory_space<vmem>>, vector<2x1x16x128xf32>,
      %c0_145 = arith.constant 0 : index
      %c4 = arith.constant 4 : index
      %c0_146 = arith.constant 0 : index
      %c0_147 = arith.constant 0 : index
      %211 = vector.load %arg15[%c0_145, %c4, %c0_146, %c0_147] : memref<2x8x16x128xf32, #tpu.memory_space<vmem>>, vector<2x1x16x128xf32>
      %212 = vector.shape_cast %211 : vector<2x1x16x128xf32> to vector<2x16x128xf32>
      %213 = arith.mulf %212, %207 : vector<2x16x128xf32>
      %c0_148 = arith.constant 0 : index
      %c4_149 = arith.constant 4 : index
      %c0_150 = arith.constant 0 : index
      %c0_151 = arith.constant 0 : index
      %214 = vector.load %arg16[%c0_148, %c4_149, %c0_150, %c0_151] : memref<2x8x16x128xf32, #tpu.memory_space<vmem>>, vector<2x1x16x128xf32>
      %215 = vector.shape_cast %214 : vector<2x1x16x128xf32> to vector<2x16x128xf32>
      %216 = arith.addf %213, %215 : vector<2x16x128xf32>
      %c0_152 = arith.constant 0 : index
      %c4_153 = arith.constant 4 : index
      %c0_154 = arith.constant 0 : index
      %c0_155 = arith.constant 0 : index
      %217 = vector.load %arg16[%c0_152, %c4_153, %c0_154, %c0_155] : memref<2x8x16x128xf32, #tpu.memory_space<vmem>>, vector<2x1x16x128xf32>
      %218 = vector.shape_cast %217 : vector<2x1x16x128xf32> to vector<2x16x128xf32>
      %219 = vector.shape_cast %216 : vector<2x16x128xf32> to vector<2x1x16x128xf32>
      tpu.vector_store %arg16[%c0_152, %c4_153, %c0_154, %c0_155], %219 {strides = array<i32>} : memref<2x8x16x128xf32, #tpu.memory_space<vmem>>, vector<2x1x16x128xf32>,
      %c0_156 = arith.constant 0 : index
      %c5 = arith.constant 5 : index
      %c0_157 = arith.constant 0 : index
      %c0_158 = arith.constant 0 : index
      %220 = vector.load %arg15[%c0_156, %c5, %c0_157, %c0_158] : memref<2x8x16x128xf32, #tpu.memory_space<vmem>>, vector<2x1x16x128xf32>
      %221 = vector.shape_cast %220 : vector<2x1x16x128xf32> to vector<2x16x128xf32>
      %222 = arith.mulf %221, %216 : vector<2x16x128xf32>
      %c0_159 = arith.constant 0 : index
      %c5_160 = arith.constant 5 : index
      %c0_161 = arith.constant 0 : index
      %c0_162 = arith.constant 0 : index
      %223 = vector.load %arg16[%c0_159, %c5_160, %c0_161, %c0_162] : memref<2x8x16x128xf32, #tpu.memory_space<vmem>>, vector<2x1x16x128xf32>
      %224 = vector.shape_cast %223 : vector<2x1x16x128xf32> to vector<2x16x128xf32>
      %225 = arith.addf %222, %224 : vector<2x16x128xf32>
      %c0_163 = arith.constant 0 : index
      %c5_164 = arith.constant 5 : index
      %c0_165 = arith.constant 0 : index
      %c0_166 = arith.constant 0 : index
      %226 = vector.load %arg16[%c0_163, %c5_164, %c0_165, %c0_166] : memref<2x8x16x128xf32, #tpu.memory_space<vmem>>, vector<2x1x16x128xf32>
      %227 = vector.shape_cast %226 : vector<2x1x16x128xf32> to vector<2x16x128xf32>
      %228 = vector.shape_cast %225 : vector<2x16x128xf32> to vector<2x1x16x128xf32>
      tpu.vector_store %arg16[%c0_163, %c5_164, %c0_165, %c0_166], %228 {strides = array<i32>} : memref<2x8x16x128xf32, #tpu.memory_space<vmem>>, vector<2x1x16x128xf32>,
      %c0_167 = arith.constant 0 : index
      %c6 = arith.constant 6 : index
      %c0_168 = arith.constant 0 : index
      %c0_169 = arith.constant 0 : index
      %229 = vector.load %arg15[%c0_167, %c6, %c0_168, %c0_169] : memref<2x8x16x128xf32, #tpu.memory_space<vmem>>, vector<2x1x16x128xf32>
      %230 = vector.shape_cast %229 : vector<2x1x16x128xf32> to vector<2x16x128xf32>
      %231 = arith.mulf %230, %225 : vector<2x16x128xf32>
      %c0_170 = arith.constant 0 : index
      %c6_171 = arith.constant 6 : index
      %c0_172 = arith.constant 0 : index
      %c0_173 = arith.constant 0 : index
      %232 = vector.load %arg16[%c0_170, %c6_171, %c0_172, %c0_173] : memref<2x8x16x128xf32, #tpu.memory_space<vmem>>, vector<2x1x16x128xf32>
      %233 = vector.shape_cast %232 : vector<2x1x16x128xf32> to vector<2x16x128xf32>
      %234 = arith.addf %231, %233 : vector<2x16x128xf32>
      %c0_174 = arith.constant 0 : index
      %c6_175 = arith.constant 6 : index
      %c0_176 = arith.constant 0 : index
      %c0_177 = arith.constant 0 : index
      %235 = vector.load %arg16[%c0_174, %c6_175, %c0_176, %c0_177] : memref<2x8x16x128xf32, #tpu.memory_space<vmem>>, vector<2x1x16x128xf32>
      %236 = vector.shape_cast %235 : vector<2x1x16x128xf32> to vector<2x16x128xf32>
      %237 = vector.shape_cast %234 : vector<2x16x128xf32> to vector<2x1x16x128xf32>
      tpu.vector_store %arg16[%c0_174, %c6_175, %c0_176, %c0_177], %237 {strides = array<i32>} : memref<2x8x16x128xf32, #tpu.memory_space<vmem>>, vector<2x1x16x128xf32>,
      %c0_178 = arith.constant 0 : index
      %c7 = arith.constant 7 : index
      %c0_179 = arith.constant 0 : index
      %c0_180 = arith.constant 0 : index
      %238 = vector.load %arg15[%c0_178, %c7, %c0_179, %c0_180] : memref<2x8x16x128xf32, #tpu.memory_space<vmem>>, vector<2x1x16x128xf32>
      %239 = vector.shape_cast %238 : vector<2x1x16x128xf32> to vector<2x16x128xf32>
      %240 = arith.mulf %239, %234 : vector<2x16x128xf32>
      %c0_181 = arith.constant 0 : index
      %c7_182 = arith.constant 7 : index
      %c0_183 = arith.constant 0 : index
      %c0_184 = arith.constant 0 : index
      %241 = vector.load %arg16[%c0_181, %c7_182, %c0_183, %c0_184] : memref<2x8x16x128xf32, #tpu.memory_space<vmem>>, vector<2x1x16x128xf32>
      %242 = vector.shape_cast %241 : vector<2x1x16x128xf32> to vector<2x16x128xf32>
      %243 = arith.addf %240, %242 : vector<2x16x128xf32>
      %c0_185 = arith.constant 0 : index
      %c7_186 = arith.constant 7 : index
      %c0_187 = arith.constant 0 : index
      %c0_188 = arith.constant 0 : index
      %244 = vector.load %arg16[%c0_185, %c7_186, %c0_187, %c0_188] : memref<2x8x16x128xf32, #tpu.memory_space<vmem>>, vector<2x1x16x128xf32>
      %245 = vector.shape_cast %244 : vector<2x1x16x128xf32> to vector<2x16x128xf32>
      %246 = vector.shape_cast %243 : vector<2x16x128xf32> to vector<2x1x16x128xf32>
      tpu.vector_store %arg16[%c0_185, %c7_186, %c0_187, %c0_188], %246 {strides = array<i32>} : memref<2x8x16x128xf32, #tpu.memory_space<vmem>>, vector<2x1x16x128xf32>,
      %c0_189 = arith.constant 0 : index
      %c0_190 = arith.constant 0 : index
      %c0_191 = arith.constant 0 : index
      %c0_192 = arith.constant 0 : index
      %247 = vector.load %arg16[%c0_189, %c0_190, %c0_191, %c0_192] : memref<2x8x16x128xf32, #tpu.memory_space<vmem>>, vector<2x8x16x128xf32>
      %248 = vector.broadcast %162 : vector<2x8x16x1xf32> to vector<2x8x16x128xf32>
      %249 = arith.mulf %248, %247 : vector<2x8x16x128xf32>
      %cst_193 = arith.constant dense<0.000000e+00> : vector<2x8x128xf32>
      %250 = vector.multi_reduction <add>, %249, %cst_193 [2] : vector<2x8x16x128xf32> to vector<2x8x128xf32>
      %c0_194 = arith.constant 0 : index
      %251 = arith.index_cast %140 : i32 to index
      %c0_195 = arith.constant 0 : index
      %252 = vector.load %arg14[%c0_194, %251, %c0_195] : memref<2x16x128xf32, #tpu.memory_space<vmem>>, vector<2x8x128xf32>
      tpu.vector_store %arg14[%c0_194, %251, %c0_195], %250 {strides = array<i32>} : memref<2x16x128xf32, #tpu.memory_space<vmem>>, vector<2x8x128xf32>,
      scf.yield %243 : vector<2x16x128xf32>
    }
    %c2_i32_62 = arith.constant 2 : i32
    %c0_63 = arith.constant 0 : index
    %c0_64 = arith.constant 0 : index
    %c0_65 = arith.constant 0 : index
    %115 = vector.load %arg10[%c0_63, %c0_64, %c0_65] : memref<2x16x128xf32, #tpu.memory_space<vmem>>, vector<2x16x128xf32>
    %c0_66 = arith.constant 0 : index
    %c0_67 = arith.constant 0 : index
    %c0_68 = arith.constant 0 : index
    %116 = vector.load %arg14[%c0_66, %c0_67, %c0_68] : memref<2x16x128xf32, #tpu.memory_space<vmem>>, vector<2x16x128xf32>
    %117 = vector.shape_cast %90 : vector<1x128xf32> to vector<1x1x128xf32>
    %118 = vector.broadcast %117 : vector<1x1x128xf32> to vector<2x16x128xf32>
    %119 = arith.mulf %118, %115 : vector<2x16x128xf32>
    %120 = arith.addf %116, %119 : vector<2x16x128xf32>
    %c0_69 = arith.constant 0 : index
    %c0_70 = arith.constant 0 : index
    %c0_71 = arith.constant 0 : index
    %121 = vector.load %arg12[%c0_69, %c0_70, %c0_71] : memref<2x16x128xf32, #tpu.memory_space<vmem>>, vector<2x16x128xf32>
    %cst_72 = arith.constant 0.000000e+00 : f32
    %122 = vector.broadcast %cst_72 : f32 to vector<2x16x128xf32>
    %123 = arith.subf %122, %121 : vector<2x16x128xf32>
    %124 = math.exp %123 : vector<2x16x128xf32>
    %cst_73 = arith.constant 1.000000e+00 : f32
    %125 = vector.broadcast %cst_73 : f32 to vector<2x16x128xf32>
    %126 = arith.addf %125, %124 : vector<2x16x128xf32>
    %127 = tpu.reciprocal %126 {approx = true} : vector<2x16x128xf32> -> vector<2x16x128xf32>
    %128 = arith.mulf %121, %127 : vector<2x16x128xf32>
    %129 = arith.mulf %120, %128 : vector<2x16x128xf32>
    %130 = vector.shape_cast %129 : vector<2x16x128xf32> to vector<32x128xf32>
    %c0_74 = arith.constant 0 : index
    %c0_75 = arith.constant 0 : index
    %c0_76 = arith.constant 0 : index
    %131 = vector.load %arg8[%c0_74, %c0_75, %c0_76] : memref<1x128x128xbf16, #tpu.memory_space<vmem>>, vector<1x128x128xbf16>
    %132 = vector.shape_cast %131 : vector<1x128x128xbf16> to vector<128x128xbf16>
    %133 = arith.truncf %130 : vector<32x128xf32> to vector<32x128xbf16>
    %cst_77 = arith.constant dense<0.000000e+00> : vector<32x128xf32>
    %134 = tpu.matmul %133, %132, %cst_77 {dimension_numbers = #tpu.dot_dimension_numbers<[1], [0], [0], [1], [0, 0, 1, 1], [], []>} : vector<32x128xbf16>, vector<128x128xbf16>, vector<32x128xf32> -> vector<32x128xf32>
    %135 = vector.shape_cast %134 : vector<32x128xf32> to vector<2x16x128xf32>
    %c0_78 = arith.constant 0 : index
    %c0_79 = arith.constant 0 : index
    %c0_80 = arith.constant 0 : index
    %136 = vector.load %arg9[%c0_78, %c0_79, %c0_80] : memref<2x16x128xf32, #tpu.memory_space<vmem>>, vector<2x16x128xf32>
    %137 = arith.addf %135, %136 : vector<2x16x128xf32>
    %c0_81 = arith.constant 0 : index
    %c0_82 = arith.constant 0 : index
    %c0_83 = arith.constant 0 : index
    %138 = vector.load %arg9[%c0_81, %c0_82, %c0_83] : memref<2x16x128xf32, #tpu.memory_space<vmem>>, vector<2x16x128xf32>
    tpu.vector_store %arg9[%c0_81, %c0_82, %c0_83], %137 {strides = array<i32>} : memref<2x16x128xf32, #tpu.memory_space<vmem>>, vector<2x16x128xf32>,
    return
  }
  func.func @transform_0(%arg0: i32, %arg1: i32) -> (i32, i32, i32) {
    %c0_i32 = arith.constant 0 : i32
    %c0_i32_0 = arith.constant 0 : i32
    %c0_i32_1 = arith.constant 0 : i32
    return %arg0, %c0_i32, %c0_i32_0 : i32, i32, i32
  }
  func.func @transform_1(%arg0: i32, %arg1: i32) -> (i32, i32, i32) {
    %c0_i32 = arith.constant 0 : i32
    %c0_i32_0 = arith.constant 0 : i32
    %c0_i32_1 = arith.constant 0 : i32
    return %arg1, %c0_i32, %c0_i32_0 : i32, i32, i32
  }
  func.func @transform_2(%arg0: i32, %arg1: i32) -> (i32, i32, i32) {
    %c0_i32 = arith.constant 0 : i32
    %c0_i32_0 = arith.constant 0 : i32
    %c0_i32_1 = arith.constant 0 : i32
    return %arg1, %c0_i32, %c0_i32_0 : i32, i32, i32
  }
  func.func @transform_3(%arg0: i32, %arg1: i32) -> (i32, i32, i32) {
    %c0_i32 = arith.constant 0 : i32
    %c0_i32_0 = arith.constant 0 : i32
    %c0_i32_1 = arith.constant 0 : i32
    return %arg1, %c0_i32, %c0_i32_0 : i32, i32, i32
  }
  func.func @transform_4(%arg0: i32, %arg1: i32) -> (i32, i32, i32) {
    %c0_i32 = arith.constant 0 : i32
    %c0_i32_0 = arith.constant 0 : i32
    %c0_i32_1 = arith.constant 0 : i32
    return %arg1, %c0_i32, %c0_i32_0 : i32, i32, i32
  }
  func.func @transform_5(%arg0: i32, %arg1: i32) -> (i32, i32, i32) {
    %c0_i32 = arith.constant 0 : i32
    %c0_i32_0 = arith.constant 0 : i32
    %c0_i32_1 = arith.constant 0 : i32
    return %arg1, %c0_i32, %c0_i32_0 : i32, i32, i32
  }
  func.func @transform_6(%arg0: i32, %arg1: i32) -> (i32, i32, i32) {
    %c0_i32 = arith.constant 0 : i32
    %c0_i32_0 = arith.constant 0 : i32
    %c0_i32_1 = arith.constant 0 : i32
    return %arg1, %c0_i32, %c0_i32_0 : i32, i32, i32
  }
  func.func @transform_7(%arg0: i32, %arg1: i32) -> (i32, i32, i32) {
    %c0_i32 = arith.constant 0 : i32
    %c0_i32_0 = arith.constant 0 : i32
    %c0_i32_1 = arith.constant 0 : i32
    return %arg0, %c0_i32, %c0_i32_0 : i32, i32, i32
  }
}

</mosaic_0001>

<bundles_post_ra>
// kernel: tpu_custom_call.1
= control target key start
LH: loop header
LB: loop body
LE: loop exit
PB: predicated region body
PF: predicated region fallthrough
CT: control target
= control target key end

     0   :  { %s4553_s0 = inlined_call_operand.hbm [shape: f32[2,16,128], index: 0, kind: input, shape index: {}]   ;;  %s4554_s1 = inlined_call_operand.hbm [shape: f32[2,1,128], index: 1, kind: input, shape index: {}]   ;;  %s4555_s2 = inlined_call_operand.vmem [shape: f32[2,22,128], index: 2, kind: input, shape index: {}]   ;;  %s4556_s3 = inlined_call_operand.vmem [shape: bf16[2,128,256], index: 3, kind: input, shape index: {}]   ;;  %s4557_s4 = inlined_call_operand.vmem [shape: bf16[2,128,160], index: 4, kind: input, shape index: {}]   ;;  %s4558_s5 = inlined_call_operand.vmem [shape: bf16[2,128,128], index: 5, kind: input, shape index: {}]   ;;  %s4559_s6 = inlined_call_operand.vmem [shape: bf16[2,128,128], index: 6, kind: input, shape index: {}]   ;;  %s4560_s7 = inlined_call_operand.hbm [shape: f32[2,16,128], index: 7, kind: output, shape index: {}]  }
   0x1   :  { %4564 = sst [smem:[#allocation19_spill]] %s4553_s0 }
   0x2   :  { %4565 = sst [smem:[#allocation20_spill]] %s4554_s1 }
   0x3   :  { %12 = vsyncpa [#allocation10], 0 }
   0x4   :  { %13 = vsyncpa [#allocation13], 0 }
   0x5   :  { %15 = vsyncpa [#allocation13 + $0x1], 0 }
   0x6   :  { %16 = vsyncpa [#allocation11], 0  ;;  %s3538_s24 = smov 0   ;;  %s3540_s25 = smov 0  }
   0x7   :  { %s3542_s26 = smov 0   ;;  %s3544_s27 = smov 0  }
   0x8   :  { %s3546_s28 = smov 0   ;;  %s3548_s29 = smov 0  }
   0x9 LB: > { %s4561_s30 = sadd.s32 4294967295, %s3464_s29   ;;  %p80_p0 = scmp.ne.s32.totalorder %s3448_s25, %s3444_s24  ;;  %s3464_s29 = sphi %s3548_s29, %s22_s29   ;;  %s3460_s28 = sphi %s3546_s28, %s4585_s28   ;;  %s3456_s27 = sphi %s3544_s27, %s4584_s27   ;;  %s3452_s26 = sphi %s3542_s26, %s4583_s26   ;;  %s3448_s25 = sphi %s3540_s25, %s4582_s25   ;;  %s3444_s24 = sphi %s3538_s24, %s4581_s24  }
   0xa   : > { %p3570_p1 = scmp.eq.s32.totalorder %s4561_s30, 0  ;;  %p2914_p2 = scmp.ge.s32.totalorder %s3464_s29, 1 }
   0xb   : > { %p247_p3 = scmp.lt.s32.totalorder %s3464_s29, 3  ;;  %s3486_s11 = smov [#allocation9]  }
   0xc   : > { %p3578_p4 = por %p3570_p1, %p80_p0  ;;  %s263_s12 = sshll.u32 %s3486_s11, 4  ;;  %s264_s12 = int_to_ptr.vmem [resolvable:$true] %s263_s12 }
   0xd   : > { %p3582_p5 = pnand %p2914_p2, %p247_p3  ;;  %s31_s14 = sadd.s32 1, %s3460_s28 }
   0xe   : > { %s3319_s15 = scalar_lea.vmem %s264_s12, 512  ;;  %p3327_p12 = scmp.lt.s32.totalorder %s264_s12, %s264_s12 }
   0xf   : > { %p3067_p6 = pneg %p3582_p5  ;;  %p3320_p9 = scmp.ne.s32.totalorder %s264_s12, %s3319_s15 }
  0x10   : > { %p3328_p13 = scmp.lt.s32.totalorder %s3319_s15, %s3319_s15 }
  0x11   : > { %p3590_p7 = pnand %p3067_p6, %p3570_p1 }
  0x12   : > { %p3329_p0 = por %p3328_p13, %p3327_p12 }
  0x13   : > { %p3310_p8 = pneg %p3590_p7 }
  0x15   : > { %p3322_p10 = pnand %p3320_p9, %p3310_p8 }
  0x17   : > { %p3323_p11 = pneg %p3322_p10 }
  0x19   : > { %p3330_p2 = pnand %p3329_p0, %p3323_p11 }
  0x1b   : > { %3333 = shalt.err (!%p3330_p2)
}
  0x1c   : > { %s3487_s16 = smov 128   ;;  %s3488_s17 = smov 8  }
  0x1d   : > { %s4570_s0 = sld [smem:[#allocation19_spill]]  ;;  %p32_p3 = scmp.ge.s32.totalorder %s31_s14, 2 }
  0x1e   : > { %s67_s20 = sadd.s32 1, %s3452_s26  ;;  %p74_p6 = scmp.ne.s32.totalorder %s3452_s26, %s3448_s25 }
  0x1f   : > { %p75_p8 = scmp.eq.s32.totalorder %s3464_s29, 0  ;;  %s4587_s14 = smov (%p32_p3, %s31_s14), 0 }
  0x20   : > { %p3076_p10 = scmp.lt.s32.totalorder %s3464_s29, 2  ;;  %s64_s21 = ssub.s32 %s3460_s28, %s4587_s14 }
  0x21   : > { %p76_p9 = por %p75_p8, %p74_p6  ;;  %s277_s22 = sand.u32 1, %s3452_s26  }
  0x22   : > { %p65_p11 = scmp.eq.s32.totalorder %s64_s21, 0  ;;  %s2917_s23 = sshll.u32 %s3460_s28, 4 }
  0x23   : > { %3070 = dma.hbm_to_vmem [thread:$0]  (!%p3590_p7), %s4570_s0, 512, %s264_s12, [#allocation10], %s3487_s16, %s3487_s16, %s3488_s17  }
  0x24   : > { %s3614_s24 = scalar_select %p65_p11, %s3452_s26, %s67_s20  }
  0x25   : > { %s4571_s1 = sld [smem:[#allocation20_spill]]  ;;  %s280_s12 = scalar_lea.vmem [#allocation12], %s277_s22 }
  0x26   : > { %s287_s16 = sshll.u32 %s280_s12, 4  ;;  %p3619_p7 = pnand %p3076_p10, %p76_p9  ;;  %s288_s16 = int_to_ptr.vmem [resolvable:$true] %s287_s16 }
  0x27   : > { %s278_s18 = scalar_lea.sflag [#allocation13], %s277_s22  ;;  %s3347_s19 = scalar_lea.vmem %s288_s16, 16 }
  0x28   : > { %p3336_p12 = pneg %p3619_p7  ;;  %p3348_p13 = scmp.ne.s32.totalorder %s288_s16, %s3347_s19 }
  0x29   : > { %s3489_s20 = smov [#allocation12]  }
  0x2a   : > { %p3350_p0 = pnand %p3348_p13, %p3336_p12  ;;  %s3352_s21 = sshll.u32 %s3489_s20, 4  ;;  %s3353_s21 = int_to_ptr.vmem [resolvable:$false] %s3352_s21 }
  0x2b   : > { %s285_s15 = scalar_lea.hbm %s4571_s1, %s2917_s23  ;;  %s3354_s11 = scalar_lea.vmem %s3353_s21, 32 }
  0x2c   : > { %p3351_p2 = pneg %p3350_p0  ;;  %p3355_p3 = scmp.lt.s32.totalorder %s288_s16, %s3353_s21 }
  0x2d   : > { %p3356_p6 = scmp.lt.s32.totalorder %s3354_s11, %s3347_s19 }
  0x2f   : > { %p3357_p8 = por %p3356_p6, %p3355_p3 }
  0x31   : > { %p3358_p11 = pnand %p3357_p8, %p3351_p2 }
  0x33   : > { %3361 = shalt.err (!%p3358_p11)
}
  0x34   : > { %3074 = dma.hbm_to_vmem [thread:$0]  (!%p3619_p7), %s285_s15, 16, %s288_s16, %s278_s18  }
  0x35   : > { %336 = sbr.rel (%p3582_p5) target bundleno = 1698 (0x6a2), region = 48 }
  0x3a   : > { %3431 = dma.done.wait (%p3570_p1), [#allocation10], 512  }
  0x3b   : > { %3433 = vsyncadd (%p3570_p1), [#allocation10], 4294966784  ;;  %s342_s22 = sand.u32 1, %s3448_s25  }
  0x3c   : > { %s343_s23 = scalar_lea.sflag [#allocation13], %s342_s22  ;;  %s3634_s13 = scalar_lea.vmem [#allocation12], %s342_s22 }
  0x3d   : > { %3435 = dma.done.wait (%p3578_p4), %s343_s23, 16  }
  0x3e   : > { %3437 = vsyncadd (%p3578_p4), %s343_s23, 4294967280  ;;  %p396_p5 = scmp.lt.s32.totalorder %s3456_s27, 1  ;;  %p2929_p1 = scmp.ne.s32.totalorder %s3456_s27, 0 }
  0x40   : > { %s397_s10 = scalar_select %p396_p5, %s3456_s27, 1 }
  0x41   : > { %426 = sbr.rel (%p2929_p1) target bundleno = 73 (0x49), region = 60 }
  0x42   : > { %s3056_s15 = smul.u32 24, %s397_s10  ;;  %s2992_s12 = sshll.u32 %s397_s10, 7 }
  0x43   : > { %s3645_s17 = scalar_lea.vmem %s4556_s3, %s2992_s12  ;;  %s3650_s20 = scalar_lea.vmem %s4557_s4, %s2992_s12 }
  0x44   : > { %s3655_s9 = scalar_lea.vmem %s4555_s2, %s3056_s15  ;;  %s2994_s22 = sshll.u32 %s397_s10, 6 }
  0x45   : > { %s3660_s0 = scalar_lea.vmem %s4558_s5, %s2994_s22  ;;  %s3665_s8 = scalar_lea.vmem %s4559_s6, %s2994_s22 }
  0x46   : > { %v427_v0 = vld [vmem:[#allocation9] sm:$0xff]  ;;  %v428_v1 = vld [vmem:[#allocation9 + $0x8] sm:$0xff]  ;;  %v429_v2 = vld [vmem:[#allocation9 + $0x10] sm:$0xff] }
  0x47   : > { %431 = vst [vmem:[#allocation14] sm:$0xff] %v427_v0  ;;  %432 = vst [vmem:[#allocation14 + $0x8] sm:$0xff] %v428_v1  ;;  %v430_v3 = vld [vmem:[#allocation9 + $0x18] sm:$0xff] }
  0x48   : > { %433 = vst [vmem:[#allocation14 + $0x10] sm:$0xff] %v429_v2  ;;  %434 = vst [vmem:[#allocation14 + $0x18] sm:$0xff] %v430_v3 }
  0x49 PF: > { %v3179_v10 = vld [vmem:[%s3645_s17 + $0x74] ss:$8 sps:$4 sm:$0xff]   ;;  %v3181_v11 = vld [vmem:[%s3645_s17 + $0x70] ss:$8 sps:$4 sm:$0xff]   ;;  %v3182_v14 = vld [vmem:[%s3645_s17 + $0x64] ss:$8 sps:$4 sm:$0xff]   ;;  %v633_v56 = vlaneseq }
  0x4a   : > { %576 = vmatprep.subr.bf16.mxu0 %v3179_v10  ;;  %v3184_v15 = vld [vmem:[%s3645_s17 + $0x60] ss:$8 sps:$4 sm:$0xff]   ;;  %v3185_v16 = vld [vmem:[%s3645_s17 + $0x54] ss:$8 sps:$4 sm:$0xff]   ;;  %v3187_v17 = vld [vmem:[%s3645_s17 + $0x50] ss:$8 sps:$4 sm:$0xff]  }
  0x4b   : > { %577 = vmatpush1.bf16.msra.mxu0 %v3181_v11  ;;  %v3188_v18 = vld [vmem:[%s3645_s17 + $0x44] ss:$8 sps:$4 sm:$0xff]   ;;  %v3190_v19 = vld [vmem:[%s3645_s17 + $0x40] ss:$8 sps:$4 sm:$0xff]   ;;  %v3191_v20 = vld [vmem:[%s3645_s17 + $0x34] ss:$8 sps:$4 sm:$0xff]  }
  0x4c   : > { %578 = vmatprep.subr.bf16.mxu0 %v3182_v14  ;;  %v3193_v21 = vld [vmem:[%s3645_s17 + $0x30] ss:$8 sps:$4 sm:$0xff]   ;;  %v3194_v22 = vld [vmem:[%s3645_s17 + $0x24] ss:$8 sps:$4 sm:$0xff]   ;;  %v3490_v23 = vmov 0   ;;  %v3708_v57 = vshrl.u32 %v633_v56, 7 }
  0x4d   : > { %608 = vmatprep.mubr.bf16.mxu0 %v3490_v23  ;;  %893 = vmatprep.mubr.bf16.mxu1 %v3490_v23  ;;  %v3196_v24 = vld [vmem:[%s3645_s17 + $0x20] ss:$8 sps:$4 sm:$0xff]   ;;  %v3197_v25 = vld [vmem:[%s3645_s17 + $0x14] ss:$8 sps:$4 sm:$0xff]   ;;  %v3199_v26 = vld [vmem:[%s3645_s17 + $0x10] ss:$8 sps:$4 sm:$0xff]  }
  0x4e   : > { %v3668_v4 = vld [vmem:[#allocation14] sm:$0xff]  ;;  %v3672_v6 = vld [vmem:[#allocation14 + $0x8] sm:$0xff]  ;;  %v2930_v44 = vld [vmem:[%s3634_s13] ss:$0 sm:$0xff]  ;;  %4573 = vst [vmem:[#allocation18_spill] sm:$0xff] %v3708_v57  ;;  %v635_v58 = vadd.s32 8, %v3708_v57 }
  0x4f   : > { %v3670_v5 = vld [vmem:[#allocation14 + $0x10] sm:$0xff]  ;;  %v439_v7 = vmul.f32 %v3668_v4, %v3668_v4  ;;  %v3678_v9 = vld [vmem:[#allocation14 + $0x18] sm:$0xff]  ;;  %v440_v12 = vmul.f32 %v3672_v6, %v3672_v6  ;;  %579 = vmatpush1.bf16.msra.mxu0 %v3184_v15  ;;  %v3200_v27 = vld [vmem:[%s3645_s17 + $0x4] ss:$8 sps:$4 sm:$0xff]   ;;  %v1086_v59 = vand.u32 127, %v633_v56  ;;  %v3491_v60 = vmov 0.0  }
  0x50   : > { %v441_v8 = vmul.f32 %v3670_v5, %v3670_v5  ;;  %v442_v13 = vmul.f32 %v3678_v9, %v3678_v9  ;;  %580 = vmatprep.subr.bf16.mxu0 %v3185_v16  ;;  %v3202_v28 = vld [vmem:[%s3645_s17] ss:$8 sps:$4 sm:$0xff]   ;;  %v3203_v63 = vld [vmem:[%s3650_s20 + $0x74] ss:$8 sps:$4 sm:$0xff]   ;;  %v3205_v0 = vld [vmem:[%s3650_s20 + $0x70] ss:$8 sps:$4 sm:$0xff]  }
  0x51   : > { %443 = vadd.xlane.f32.xlu0 %v439_v7  ;;  %vm1087_vm0 = vcmp.eq.s32.totalorder %v3708_v57, %v1086_v59  ;;  %vm1088_vm1 = vcmp.eq.s32.totalorder %v635_v58, %v1086_v59  ;;  %v3206_v1 = vld [vmem:[%s3650_s20 + $0x64] ss:$8 sps:$4 sm:$0xff]   ;;  %861 = vmatprep.subr.bf16.mxu1 %v3203_v63  ;;  %v3208_v2 = vld [vmem:[%s3650_s20 + $0x60] ss:$8 sps:$4 sm:$0xff]   ;;  %v3209_v3 = vld [vmem:[%s3650_s20 + $0x54] ss:$8 sps:$4 sm:$0xff]  }
  0x52   : > { %447 = vadd.xlane.f32.xlu1 %v441_v8  ;;  %v3712_v61 = vsel %vm1087_vm0, 1.0, %v3491_v60  ;;  %v3714_v62 = vsel %vm1088_vm1, 1.0, %v3491_v60  ;;  %862 = vmatpush1.bf16.msra.mxu1 %v3205_v0  ;;  %v3215_v7 = vld [vmem:[%s3650_s20 + $0x34] ss:$8 sps:$4 sm:$0xff]   ;;  %v3217_v8 = vld [vmem:[%s3650_s20 + $0x30] ss:$8 sps:$4 sm:$0xff]  }
  0x53   : > { %581 = vmatpush1.bf16.msra.mxu0 %v3187_v17  ;;  %863 = vmatprep.subr.bf16.mxu1 %v3206_v1  ;;  %v3220_v10 = vld [vmem:[%s3650_s20 + $0x20] ss:$8 sps:$4 sm:$0xff]   ;;  %v3221_v11 = vld [vmem:[%s3650_s20 + $0x14] ss:$8 sps:$4 sm:$0xff]   ;;  %vm649_vm2 = vcmp.lt.s32.totalorder %v3708_v57, 3  ;;  %vm676_vm3 = vcmp.lt.s32.totalorder %v3708_v57, 2 }
  0x54   : > { %582 = vmatprep.subr.bf16.mxu0 %v3188_v18  ;;  %v3226_v14 = vld [vmem:[%s3650_s20] ss:$8 sps:$4 sm:$0xff]   ;;  %v3227_v15 = vld [vmem:[%s3660_s0 + $0x38] sm:$0xff]   ;;  %v3228_v16 = vld [vmem:[%s3660_s0 + $0x30] sm:$0xff]   ;;  %vm703_vm4 = vcmp.lt.s32.totalorder %v3708_v57, 1  ;;  %vm914_vm5 = vcmask 261120  }
  0x55   : > { %445 = vadd.xlane.f32.xlu0 %v440_v12  ;;  %v3223_v12 = vld [vmem:[%s3650_s20 + $0x10] ss:$8 sps:$4 sm:$0xff]   ;;  %v3229_v17 = vld [vmem:[%s3660_s0 + $0x28] sm:$0xff]   ;;  %v3230_v18 = vld [vmem:[%s3660_s0 + $0x20] sm:$0xff]  }
  0x56   : > { %449 = vadd.xlane.f32.xlu1 %v442_v13  ;;  %864 = vmatpush1.bf16.msra.mxu1 %v3208_v2  ;;  %v3224_v13 = vld [vmem:[%s3650_s20 + $0x4] ss:$8 sps:$4 sm:$0xff]  }
  0x57   : > { %583 = vmatpush1.bf16.msra.mxu0 %v3190_v19  ;;  %865 = vmatprep.subr.bf16.mxu1 %v3209_v3  ;;  %v3231_v19 = vld [vmem:[%s3660_s0 + $0x18] sm:$0xff]  }
  0x58   : > { %584 = vmatprep.subr.bf16.mxu0 %v3191_v20 }
  0x5b   : > { %585 = vmatpush1.bf16.msra.mxu0 %v3193_v21 }
  0x5c   : > { %586 = vmatprep.subr.bf16.mxu0 %v3194_v22 }
  0x5f   : > { %587 = vmatpush1.bf16.msra.mxu0 %v3196_v24 }
  0x60   : > { %588 = vmatprep.subr.bf16.mxu0 %v3197_v25 }
  0x63   : > { %589 = vmatpush1.bf16.msra.mxu0 %v3199_v26 }
  0x64   : > { %590 = vmatprep.subr.bf16.mxu0 %v3200_v27  ;;  %v2948_v27 = vld [vmem:[%s3655_s9 + $0x10] ss:$0 sm:$0xff] }
  0x67   : > { %591 = vmatpush1.bf16.msra.mxu0 %v3202_v28 }
  0x68   : > { %3016 = vmatprep.subr.bf16.mxu0 %v3227_v15 }
  0xda   : > { %v444_v29 = vpop.xlane.xlu0 %443 }
  0xdb   : > { %v448_v30 = vpop.xlane.xlu1 %447  ;;  %v451_v31 = vmul.f32 0.0625, %v444_v29 }
  0xdc   : > { %v453_v32 = vmul.f32 0.0625, %v448_v30 }
  0xdd   : > { %v455_v33 = vadd.f32 1e-06, %v451_v31  ;;  %v2947_v31 = vld [vmem:[%s3655_s9 + $0x13] ss:$0 sm:$0xff] }
  0xde   : > { %v446_v34 = vpop.xlane.xlu0 %445  ;;  %v457_v38 = vadd.f32 1e-06, %v453_v32 }
  0xdf   : > { %v450_v35 = vpop.xlane.xlu1 %449  ;;  %3235 = vrsqrt.f32 %v455_v33  ;;  %v452_v36 = vmul.f32 0.0625, %v446_v34 }
  0xe0   : > { %v454_v37 = vmul.f32 0.0625, %v450_v35  ;;  %v2949_v35 = vld [vmem:[%s3655_s9 + $0x11] ss:$0 sm:$0xff] }
  0xe1   : > { %v456_v39 = vadd.f32 1e-06, %v452_v36 }
  0xe2   : > { %v458_v40 = vadd.f32 1e-06, %v454_v37 }
  0xe3   : > { %3237 = vrsqrt.f32 %v456_v39 }
  0xe4   : > { %3239 = vrsqrt.f32 %v457_v38 }
  0xe5   : > { %3241 = vrsqrt.f32 %v458_v40  ;;  %v2950_v40 = vld [vmem:[%s3655_s9 + $0x12] ss:$0 sm:$0xff] }
  0xec   : > { %v3236_v41 = vpop.eup %3235 }
  0xed   : > { %v463_v42 = vmul.f32 %v3236_v41, %v3668_v4  ;;  %v3211_v4 = vld [vmem:[%s3650_s20 + $0x50] ss:$8 sps:$4 sm:$0xff]  }
  0xee   : > { %866 = vmatpush1.bf16.msra.mxu1 %v3211_v4 }
  0xef   : > { %v474_v48 = vmul.f32 %v2930_v44, %v463_v42 }
  0xf0   : > { %v3238_v43 = vpop.eup %3237 }
  0xf1   : > { %v3240_v45 = vpop.eup %3239  ;;  %v464_v46 = vmul.f32 %v3238_v43, %v3672_v6  ;;  %v3214_v6 = vld [vmem:[%s3650_s20 + $0x40] ss:$8 sps:$4 sm:$0xff]  }
  0xf2   : > { %v3242_v47 = vpop.eup %3241  ;;  %v465_v51 = vmul.f32 %v3240_v45, %v3670_v5  ;;  %v3212_v5 = vld [vmem:[%s3650_s20 + $0x44] ss:$8 sps:$4 sm:$0xff]  }
  0xf3   : > { %v475_v49 = vmul.f32 %v2930_v44, %v464_v46  ;;  %v466_v52 = vmul.f32 %v3242_v47, %v3678_v9  ;;  %867 = vmatprep.subr.bf16.mxu1 %v3212_v5  ;;  %v3218_v9 = vld [vmem:[%s3650_s20 + $0x24] ss:$8 sps:$4 sm:$0xff]  }
  0xf4   : > { %v476_v53 = vmul.f32 %v2930_v44, %v465_v51  ;;  %868 = vmatpush1.bf16.msra.mxu1 %v3214_v6 }
  0xf5   : > { %v494_v50 = vpack.c.bf16 %v475_v49, %v474_v48  ;;  %v477_v54 = vmul.f32 %v2930_v44, %v466_v52  ;;  %869 = vmatprep.subr.bf16.mxu1 %v3215_v7 }
  0xf7   : > { %609 = vmatmul.mubr.bf16.vlgmr.msra.gmra.mxu0 %v494_v50  ;;  %v495_v55 = vpack.c.bf16 %v477_v54, %v476_v53 }
  0xf8   : > { %618 = vmatprep.mubr.bf16.mxu0 %v3490_v23  ;;  %870 = vmatpush1.bf16.msra.mxu1 %v3217_v8 }
  0xf9   : > { %871 = vmatprep.subr.bf16.mxu1 %v3218_v9  ;;  %3017 = vmatpush3.bf16.msra.mxu0 %v3227_v15 }
  0xfa   : > { %3018 = vmatprep.subr.bf16.mxu0 %v3228_v16 }
  0xfc   : > { %872 = vmatpush1.bf16.msra.mxu1 %v3220_v10 }
  0xfd   : > { %873 = vmatprep.subr.bf16.mxu1 %v3221_v11  ;;  %3019 = vmatpush3.bf16.msra.mxu0 %v3228_v16 }
  0xfe   : > { %3020 = vmatprep.subr.bf16.mxu0 %v3229_v17 }
  0xff   : > { %619 = vmatmul.mubr.bf16.gmra.mxu0 %v495_v55 }
 0x100   : > { %874 = vmatpush1.bf16.msra.mxu1 %v3223_v12  ;;  %v2951_v12 = vld [vmem:[%s3655_s9 + $0x14] ss:$0 sm:$0xff] }
 0x101   : > { %875 = vmatprep.subr.bf16.mxu1 %v3224_v13  ;;  %3021 = vmatpush3.bf16.msra.mxu0 %v3229_v17 }
 0x102   : > { %3022 = vmatprep.subr.bf16.mxu0 %v3230_v18 }
 0x104   : > { %876 = vmatpush1.bf16.msra.mxu1 %v3226_v14 }
 0x105   : > { %3023 = vmatpush3.bf16.msra.mxu0 %v3230_v18 }
 0x106   : > { %3024 = vmatprep.subr.bf16.mxu0 %v3231_v19 }
 0x109   : > { %3025 = vmatpush3.bf16.msra.mxu0 %v3231_v19 }
 0x1b7   : > { %v3737_v20 = vpop.f32.mrf.mxu0 }
 0x1b8   : > { %v645_v22 = vrot.slane %v3737_v20, 5  ;;  %v672_v25 = vrot.slane %v3737_v20, 6  ;;  %v699_v32 = vrot.slane %v3737_v20, 7  ;;  %v641_v47 = vmul.f32 %v2947_v31, %v3737_v20 }
 0x1b9   : > { %v612_v21 = vpop.f32.mrf.mxu0 }
 0x1ba   : > { %629 = vst [vmem:[#allocation4 + $0x10] sm:$0xff] %v612_v21 }
 0x1bb   : > { %v614_v24 = vpop.f32.mrf.mxu0 }
 0x1bc   : > { %v646_v26 = vrot.slane %v614_v24, 5  ;;  %v673_v28 = vrot.slane %v614_v24, 6  ;;  %v700_v29 = vrot.slane %v614_v24, 7  ;;  %v642_v36 = vmul.f32 %v2947_v31, %v614_v24 }
 0x1bd   : > { %v616_v30 = vpop.f32.mrf.mxu0 }
 0x1be   : > { %v652_v33 = vsel %vm649_vm2, %v645_v22, %v646_v26  ;;  %v679_v34 = vsel %vm676_vm3, %v672_v25, %v673_v28  ;;  %630 = vst [vmem:[#allocation4] sm:$0xff] %v616_v30  ;;  %v706_v39 = vsel %vm703_vm4, %v699_v32, %v700_v29 }
 0x1bf   : > { %v665_v37 = vmul.f32 %v2948_v27, %v652_v33  ;;  %v620_v38 = vpop.f32.mrf.mxu0  ;;  %v692_v45 = vmul.f32 %v2949_v35, %v679_v34  ;;  %v719_v52 = vmul.f32 %v2950_v40, %v706_v39 }
 0x1c0   : > { %v647_v41 = vrot.slane %v620_v38, 5  ;;  %v674_v42 = vrot.slane %v620_v38, 6  ;;  %v701_v43 = vrot.slane %v620_v38, 7  ;;  %v643_v56 = vmul.f32 %v2947_v31, %v620_v38 }
 0x1c1   : > { %v669_v44 = vadd.f32 %v665_v37, %v642_v36  ;;  %v622_v46 = vpop.f32.mrf.mxu0 }
 0x1c2   : > { %v651_v48 = vsel %vm649_vm2, %v646_v26, %v647_v41  ;;  %v678_v49 = vsel %vm676_vm3, %v673_v28, %v674_v42  ;;  %v705_v50 = vsel %vm703_vm4, %v700_v29, %v701_v43  ;;  %631 = vst [vmem:[#allocation4 + $0x18] sm:$0xff] %v622_v46 }
 0x1c3   : > { %v696_v51 = vadd.f32 %v692_v45, %v669_v44  ;;  %v657_v53 = vsel %vm649_vm2, 0.0, %v651_v48  ;;  %v684_v54 = vsel %vm676_vm3, 0.0, %v678_v49  ;;  %v624_v55 = vpop.f32.mrf.mxu0  ;;  %v711_v59 = vsel %vm703_vm4, 0.0, %v705_v50 }
 0x1c4   : > { %v666_v58 = vmul.f32 %v2948_v27, %v657_v53  ;;  %v648_v60 = vrot.slane %v624_v55, 5  ;;  %v693_v63 = vmul.f32 %v2949_v35, %v684_v54  ;;  %v644_v0 = vmul.f32 %v2947_v31, %v624_v55 }
 0x1c5   : > { %v675_v1 = vrot.slane %v624_v55, 6  ;;  %v702_v2 = vrot.slane %v624_v55, 7  ;;  %v626_v3 = vpop.f32.mrf.mxu0  ;;  %v723_v7 = vadd.f32 %v719_v52, %v696_v51  ;;  %v720_v16 = vmul.f32 %v2950_v40, %v711_v59 }
 0x1c6   : > { %v670_v4 = vadd.f32 %v666_v58, %v643_v56  ;;  %v650_v5 = vsel %vm649_vm2, %v647_v41, %v648_v60  ;;  %v653_v6 = vsel %vm649_vm2, %v648_v60, %v645_v22  ;;  %632 = vst [vmem:[#allocation4 + $0x8] sm:$0xff] %v626_v3  ;;  %v3234_v3 = vld [vmem:[%s3660_s0] sm:$0xff]  }
 0x1c7   : > { %v655_v8 = vsel %vm649_vm2, 0.0, %v653_v6  ;;  %v667_v9 = vmul.f32 %v2948_v27, %v650_v5  ;;  %v677_v10 = vsel %vm676_vm3, %v674_v42, %v675_v1  ;;  %v680_v11 = vsel %vm676_vm3, %v675_v1, %v672_v25  ;;  %v3232_v1 = vld [vmem:[%s3660_s0 + $0x10] sm:$0xff]  }
 0x1c8   : > { %v697_v13 = vadd.f32 %v693_v63, %v670_v4  ;;  %v664_v14 = vmul.f32 %v2948_v27, %v655_v8  ;;  %v682_v15 = vsel %vm676_vm3, 0.0, %v680_v11  ;;  %v694_v18 = vmul.f32 %v2949_v35, %v677_v10  ;;  %3026 = vmatprep.subr.bf16.mxu0 %v3232_v1 }
 0x1c9   : > { %v671_v17 = vadd.f32 %v667_v9, %v644_v0  ;;  %v704_v19 = vsel %vm703_vm4, %v701_v43, %v702_v2  ;;  %v707_v20 = vsel %vm703_vm4, %v702_v2, %v699_v32  ;;  %v691_v21 = vmul.f32 %v2949_v35, %v682_v15  ;;  %3027 = vmatpush3.bf16.msra.mxu0 %v3232_v1  ;;  %v3233_v2 = vld [vmem:[%s3660_s0 + $0x8] sm:$0xff]   ;;  %v3798_v15 = vld [vmem:[%s3655_s9 + $0x15] ss:$0 sm:$0xff]  ;;  %s3812_s0 = smov 0  }
 0x1ca   : > { %v709_v22 = vsel %vm703_vm4, 0.0, %v707_v20  ;;  %v668_v24 = vadd.f32 %v664_v14, %v641_v47  ;;  %v732_v25 = vadd.f32 %v2951_v12, %v723_v7  ;;  %v721_v27 = vmul.f32 %v2950_v40, %v704_v19  ;;  %3028 = vmatprep.subr.bf16.mxu0 %v3233_v2  ;;  %v3795_v14 = vld [vmem:[%s3655_s9 + $0x8] sm:$0xff] }
 0x1cb   : > { %v698_v26 = vadd.f32 %v694_v18, %v671_v17  ;;  %v724_v28 = vadd.f32 %v720_v16, %v697_v13  ;;  %v718_v30 = vmul.f32 %v2950_v40, %v709_v22  ;;  %v3792_v13 = vld [vmem:[%s3655_s9] sm:$0xff]  ;;  %v3806_v1 = vmov 0.0  }
 0x1cc   : > { %v695_v29 = vadd.f32 %v691_v21, %v668_v24  ;;  %v736_v31 = vsub.f32 0.0, %v732_v25 }
 0x1cd   : > { %v725_v33 = vadd.f32 %v721_v27, %v698_v26  ;;  %v733_v34 = vadd.f32 %v2951_v12, %v724_v28  ;;  %3029 = vmatpush3.bf16.msra.mxu0 %v3233_v2  ;;  %v3808_v2 = vmov 0.0  }
 0x1ce   : > { %v722_v36 = vadd.f32 %v718_v30, %v695_v29  ;;  %v741_v37 = vmul.f32 1.442695, %v736_v31  ;;  %3030 = vmatprep.subr.bf16.mxu0 %v3234_v3 }
 0x1cf   : > { %v734_v38 = vadd.f32 %v2951_v12, %v725_v33  ;;  %v737_v39 = vsub.f32 0.0, %v733_v34 }
 0x1d0   : > { %v731_v41 = vadd.f32 %v2951_v12, %v722_v36  ;;  %3243 = vpow2.f32 %v741_v37 }
 0x1d1   : > { %v738_v32 = vsub.f32 0.0, %v734_v38  ;;  %v743_v35 = vmul.f32 1.442695, %v737_v39  ;;  %3031 = vmatpush3.bf16.msra.mxu0 %v3234_v3  ;;  %v3810_v3 = vmov 0.0  }
 0x1d2   : > { %v735_v42 = vsub.f32 0.0, %v731_v41 }
 0x1d3   : > { %3245 = vpow2.f32 %v743_v35  ;;  %v745_v43 = vmul.f32 1.442695, %v738_v32 }
 0x1d4   : > { %v739_v44 = vmul.f32 1.442695, %v735_v42 }
 0x1d5   : > { %3247 = vpow2.f32 %v745_v43 }
 0x1d6   : > { %3249 = vpow2.f32 %v739_v44 }
 0x1dd   : > { %v3244_v45 = vpop.eup %3243 }
 0x1de   : > { %v748_v46 = vadd.f32 1.0, %v3244_v45 }
 0x1e0   : > { %v3246_v40 = vpop.eup %3245  ;;  %3251 = vrcp.f32 %v748_v46 }
 0x1e1   : > { %v749_v47 = vadd.f32 1.0, %v3246_v40 }
 0x1e2   : > { %v3248_v48 = vpop.eup %3247 }
 0x1e3   : > { %v3250_v49 = vpop.eup %3249  ;;  %v750_v50 = vadd.f32 1.0, %v3248_v48  ;;  %3253 = vrcp.f32 %v749_v47 }
 0x1e4   : > { %v747_v51 = vadd.f32 1.0, %v3250_v49 }
 0x1e5   : > { %3255 = vrcp.f32 %v750_v50 }
 0x1e6   : > { %3257 = vrcp.f32 %v747_v51 }
 0x1ed   : > { %v3252_v52 = vpop.eup %3251 }
 0x1ee   : > { %v756_v53 = vmul.f32 %v3252_v52, %v732_v25 }
 0x1f0   : > { %v3254_v54 = vpop.eup %3253  ;;  %760 = vst [vmem:[#allocation2 + $0x8] sm:$0xff] %v756_v53 }
 0x1f1   : > { %v757_v55 = vmul.f32 %v3254_v54, %v733_v34 }
 0x1f2   : > { %v3256_v56 = vpop.eup %3255 }
 0x1f3   : > { %v3258_v58 = vpop.eup %3257  ;;  %v758_v59 = vmul.f32 %v3256_v56, %v734_v38  ;;  %761 = vst [vmem:[#allocation2 + $0x10] sm:$0xff] %v757_v55 }
 0x1f4   : > { %v755_v60 = vmul.f32 %v3258_v58, %v731_v41 }
 0x1f5   : > { %762 = vst [vmem:[#allocation2 + $0x18] sm:$0xff] %v758_v59  ;;  %v780_v0 = vpack.c.bf16 %v758_v59, %v757_v55 }
 0x1f6   : > { %759 = vst [vmem:[#allocation2] sm:$0xff] %v755_v60  ;;  %v779_v63 = vpack.c.bf16 %v756_v53, %v755_v60 }
 0x1f8   : > { %894 = vmatmul.mubr.bf16.vlgmr.msra.gmra.mxu1 %v779_v63 }
 0x1f9   : > { %903 = vmatprep.mubr.bf16.mxu1 %v3490_v23 }
 0x200   : > { %904 = vmatmul.mubr.bf16.gmra.mxu1 %v780_v0  ;;  %v3804_v0 = vmov 0.0  }
 0x2b8   : > { %v895_v4 = vpop.f32.mrf.mxu1 }
 0x2ba   : > { %v897_v5 = vpop.f32.mrf.mxu1 }
 0x2bb   : > { %915 = vst.msk [vmem:[#allocation5] sm:$0xff] %vm914_vm5, %v897_v5 }
 0x2bc   : > { %v899_v6 = vpop.f32.mrf.mxu1 }
 0x2bd   : > { %v935_v23 = vpack.c.bf16 %v899_v6, %v895_v4 }
 0x2be   : > { %v901_v7 = vpop.f32.mrf.mxu1 }
 0x2bf   : > { %916 = vst.msk [vmem:[#allocation5 + $0x8] sm:$0xff] %vm914_vm5, %v901_v7  ;;  %3032 = vmatprep.mubr.bf16.mxu0 %v935_v23 }
 0x2c0   : > { %v905_v8 = vpop.f32.mrf.mxu1 }
 0x2c2   : > { %v907_v9 = vpop.f32.mrf.mxu1 }
 0x2c3   : > { %917 = vst.msk [vmem:[#allocation5 + $0x10] sm:$0xff] %vm914_vm5, %v907_v9 }
 0x2c4   : > { %v909_v10 = vpop.f32.mrf.mxu1 }
 0x2c5   : > { %v936_v11 = vpack.c.bf16 %v909_v10, %v905_v8 }
 0x2c6   : > { %v911_v12 = vpop.f32.mrf.mxu1 }
 0x2c7   : > { %918 = vst.msk [vmem:[#allocation5 + $0x18] sm:$0xff] %vm914_vm5, %v911_v12  ;;  %3033 = vmatmul.mubr.bf16.vlgmr.msra.gmra.mxu0 %v936_v11 }
 0x387   : > { %v3034_v16 = vpop.f32.mrf.mxu0 }
 0x388   : > { %v1041_v17 = vadd.f32 %v3034_v16, %v3798_v15 }
 0x389   : > { %v1019_v18 = vpop.f32.mrf.mxu0 }
 0x38a   : > { %v1049_v19 = vand.u32 2147483647, %v1041_v17  ;;  %v1039_v20 = vadd.f32 %v3798_v15, %v1019_v18  ;;  %v1045_v40 = vmax.f32 %v1041_v17, 0.0 }
 0x38b   : > { %v3035_v21 = vpop.f32.mrf.mxu0 }
 0x38c   : > { %v1053_v22 = vsub.f32 0.0, %v1049_v19  ;;  %v1047_v24 = vand.u32 2147483647, %v1039_v20  ;;  %v1042_v25 = vadd.f32 %v3035_v21, %v3798_v15  ;;  %v1043_v50 = vmax.f32 %v1039_v20, 0.0 }
 0x38d   : > { %v1022_v26 = vpop.f32.mrf.mxu0 }
 0x38e   : > { %v1059_v27 = vmul.f32 1.442695, %v1053_v22  ;;  %v1051_v28 = vsub.f32 0.0, %v1047_v24  ;;  %v1050_v29 = vand.u32 2147483647, %v1042_v25  ;;  %v1040_v30 = vadd.f32 %v3798_v15, %v1022_v26 }
 0x38f   : > { %v1046_v54 = vmax.f32 %v1042_v25, 0.0 }
 0x390   : > { %3259 = vpow2.f32 %v1059_v27  ;;  %v1055_v31 = vmul.f32 1.442695, %v1051_v28  ;;  %v1054_v33 = vsub.f32 0.0, %v1050_v29  ;;  %v1048_v34 = vand.u32 2147483647, %v1040_v30 }
 0x391   : > { %v1044_v59 = vmax.f32 %v1040_v30, 0.0 }
 0x392   : > { %3261 = vpow2.f32 %v1055_v31  ;;  %v1061_v36 = vmul.f32 1.442695, %v1054_v33  ;;  %v1052_v37 = vsub.f32 0.0, %v1048_v34 }
 0x394   : > { %3263 = vpow2.f32 %v1061_v36  ;;  %v1057_v38 = vmul.f32 1.442695, %v1052_v37 }
 0x396   : > { %3265 = vpow2.f32 %v1057_v38 }
 0x39d   : > { %v3260_v39 = vpop.eup %3259 }
 0x39e   : > { %v1065_v41 = vadd.f32 1.0, %v3260_v39 }
 0x39f   : > { %v3262_v32 = vpop.eup %3261 }
 0x3a0   : > { %3267 = vlog2.f32 %v1065_v41  ;;  %v1063_v35 = vadd.f32 1.0, %v3262_v32 }
 0x3a1   : > { %v3264_v42 = vpop.eup %3263 }
 0x3a2   : > { %3269 = vlog2.f32 %v1063_v35  ;;  %v1066_v43 = vadd.f32 1.0, %v3264_v42 }
 0x3a3   : > { %v3266_v44 = vpop.eup %3265 }
 0x3a4   : > { %3271 = vlog2.f32 %v1066_v43  ;;  %v1064_v45 = vadd.f32 1.0, %v3266_v44 }
 0x3a6   : > { %3273 = vlog2.f32 %v1064_v45 }
 0x3ad   : > { %v3268_v46 = vpop.eup %3267 }
 0x3ae   : > { %v1072_v47 = vmul.f32 0.6931472, %v3268_v46 }
 0x3af   : > { %v3270_v48 = vpop.eup %3269 }
 0x3b0   : > { %v1077_v49 = vadd.f32 %v1072_v47, %v1045_v40  ;;  %v1068_v51 = vmul.f32 0.6931472, %v3270_v48 }
 0x3b1   : > { %v3272_v52 = vpop.eup %3271 }
 0x3b2   : > { %1081 = vst [vmem:[#allocation3 + $0x10] sm:$0xff] %v1077_v49  ;;  %v1075_v53 = vadd.f32 %v1068_v51, %v1043_v50  ;;  %v1074_v55 = vmul.f32 0.6931472, %v3272_v52 }
 0x3b3   : > { %v3274_v56 = vpop.eup %3273 }
 0x3b4   : > { %1079 = vst [vmem:[#allocation3] sm:$0xff] %v1075_v53  ;;  %v1078_v58 = vadd.f32 %v1074_v55, %v1046_v54  ;;  %v1070_v60 = vmul.f32 0.6931472, %v3274_v56 }
 0x3b6   : > { %1082 = vst [vmem:[#allocation3 + $0x18] sm:$0xff] %v1078_v58  ;;  %v1076_v63 = vadd.f32 %v1070_v60, %v1044_v59 }
 0x3b8   : > { %1080 = vst [vmem:[#allocation3 + $0x8] sm:$0xff] %v1076_v63 }
 0x3b9 LB: >> { %v4574_v57 = vld [vmem:[#allocation18_spill] sm:$0xff]  ;;  %v3492_v4 = vmov 1966171168   ;;  %s3830_s1 = sshll.u32 %s3484_s0, 3  ;;  %vm1325_vm6 = vcmask 130048   ;;  %v3275_v40 = vpack.i.bf16 %v3714_v62, %v3712_v61  ;;  %s3493_s30 = smov 16   ;;  %v3468_v0 = vphi %v3804_v0, %v2345_v0   ;;  %s3484_s0 = sphi %s3812_s0, %s1098_s0   ;;  %v3480_v3 = vphi %v3810_v3, %v4577_v3   ;;  %v3476_v2 = vphi %v3808_v2, %v4576_v2   ;;  %v3472_v1 = vphi %v3806_v1, %v4575_v1  }
 0x3ba   : >> { %v1117_v5 = vunpack.c.l.s4 %v3492_v4  ;;  %s1110_s27 = scalar_lea.vmem [#allocation5], %s3830_s1  ;;  %v3840_v9 = vsub.s32 0, %v4574_v57  ;;  %s1104_s13 = scalar_lea.vmem [#allocation3], %s3830_s1  ;;  %vm2542_vm7 = vcmask 1041409   ;;  %vm2544_vm8 = vcmask 1042434  }
 0x3bb   : >> { %v1111_v23 = vld [vmem:[%s1110_s27] sm:$0xff]  ;;  %v1112_v58 = vld [vmem:[%s1110_s27 + $0x10] sm:$0xff]  ;;  %s1107_s10 = scalar_lea.vmem [#allocation2], %s3830_s1  ;;  %s3494_s15 = smov 112   ;;  %vm2546_vm9 = vcmask 1043459   ;;  %vm2548_vm10 = vcmask 1044484  }
 0x3bc   : >> { %v1118_v6 = vunpack.c.0.s8 %v1117_v5  ;;  %v1115_v28 = vcombine.high %v1111_v23, %v1111_v23  ;;  %vm2550_vm11 = vcmask 1045509   ;;  %vm2552_vm12 = vcmask 1046534   ;;  %s2565_s12 = scalar_lea.vmem [#allocation6], %s3830_s1  ;;  %s1098_s0 = sadd.s32 1, %s3484_s0  }
 0x3bd   : >> { %vm2554_vm13 = vcmask 1047559   ;;  %p1095_p4 = scmp.ge.s32.totalorder %s1098_s0, 2  }
 0x3be   : >> { %v3836_v7 = vsub.s32 %v1118_v6, %v4574_v57  ;;  %s3495_s17 = smov (%p1095_p4), [#allocation14]   ;;  %s4578_s19 = sadd.s32 (%p1095_p4), 4294967295, %s3464_s29  }
 0x3bf   : > { %s2753_s18 = sshll.u32 (%p1095_p4), %s3495_s17, 4  ;;  %p4520_p9 = scmp.eq.s32.totalorder (%p1095_p4), %s4578_s19, 1  ;;  %s2754_s18 = int_to_ptr.vmem [resolvable:$true] %s2753_s18 }
 0x3c0   : >> { %v1122_v8 = vrot.slane %v1111_v23, %v3836_v7  ;;  %v1129_v37 = vrot.slane %v1115_v28, %v3836_v7  ;;  %v1171_v4 = vrot.slane %v1112_v58, %v3836_v7  ;;  %s3362_s21 = scalar_lea.vmem (%p1095_p4), %s2754_s18, 512  ;;  %p3369_p13 = scmp.lt.s32.totalorder (%p1095_p4), %s2754_s18, %s2754_s18 }
 0x3c1   : > { %p3363_p10 = scmp.ne.s32.totalorder (%p1095_p4), %s2754_s18, %s3362_s21  ;;  %p3370_p0 = scmp.lt.s32.totalorder (%p1095_p4), %s3362_s21, %s3362_s21 }
 0x3c2   : >> { %v1138_v10 = vrot.slane %v1122_v8, %v3836_v7  ;;  %v1130_v11 = vcombine.high %v1122_v8, %v1122_v8  ;;  %v1145_v41 = vrot.slane %v1129_v37, %v3836_v7  ;;  %v1131_v43 = vcombine.high %v1129_v37, %v1129_v37  ;;  %v1108_v37 = vld [vmem:[%s1107_s10] sm:$0xff] }
 0x3c3   : >> { %v3918_v23 = vrot.slane %v1171_v4, %v3836_v7  ;;  %p3364_p7 = pnand (%p1095_p4), %p3363_p10, %p4520_p9  ;;  %p3371_p2 = por (%p1095_p4), %p3370_p0, %p3369_p13 }
 0x3c4   : >> { %v3844_v12 = vrot.slane %v1138_v10, %v3840_v9  ;;  %v1152_v16 = vrot.slane %v1130_v11, %v3836_v7  ;;  %v1160_v17 = vcombine.high %v1138_v10, %v1138_v10  ;;  %v3882_v42 = vrot.slane %v1145_v41, %v3840_v9 }
 0x3c5   : >> { %v1159_v46 = vrot.slane %v1131_v43, %v3836_v7  ;;  %v1161_v50 = vcombine.high %v1145_v41, %v1145_v41  ;;  %v3925_v11 = vrot.slane %v3918_v23, %v3840_v9  ;;  %p3365_p12 = pneg (%p1095_p4), %p3364_p7 }
 0x3c6   : >> { %v1293_v18 = vmul.f32 %v3712_v61, %v3844_v12  ;;  %v3850_v19 = vrot.slane %v1152_v16, %v3840_v9  ;;  %v1294_v20 = vmul.f32 %v3714_v62, %v3844_v12  ;;  %v3860_v25 = vrot.slane %v1160_v17, %v3840_v9 }
 0x3c7   : >> { %v1162_v31 = vcombine.high %v1152_v16, %v1152_v16  ;;  %v1301_v45 = vmul.f32 %v3712_v61, %v3882_v42  ;;  %v1302_v48 = vmul.f32 %v3714_v62, %v3882_v42  ;;  %v3894_v49 = vrot.slane %v1159_v46, %v3840_v9  ;;  %p3372_p3 = pnand (%p1095_p4), %p3371_p2, %p3365_p12 }
 0x3c8   : >> { %v1326_v21 = vsel %vm1325_vm6, %v1293_v18, 0.0  ;;  %v1295_v22 = vmul.f32 %v3712_v61, %v3850_v19  ;;  %v1296_v24 = vmul.f32 %v3714_v62, %v3850_v19  ;;  %v1329_v27 = vsel %vm1325_vm6, %v1294_v20, 0.0 }
 0x3c9   : >> { %1327 = vadd.xlane.f32.xlu0 %v1326_v21  ;;  %v1297_v30 = vmul.f32 %v3712_v61, %v3860_v25  ;;  %v1298_v34 = vmul.f32 %v3714_v62, %v3860_v25  ;;  %v3871_v36 = vrot.slane %v1162_v31, %v3840_v9  ;;  %v1350_v47 = vsel %vm1325_vm6, %v1301_v45, 0.0 }
 0x3ca   : >> { %v1332_v26 = vsel %vm1325_vm6, %v1295_v22, 0.0  ;;  %v1335_v29 = vsel %vm1325_vm6, %v1296_v24, 0.0  ;;  %v1353_v51 = vsel %vm1325_vm6, %v1302_v48, 0.0  ;;  %v1304_v52 = vmul.f32 %v3714_v62, %v3894_v49 }
 0x3cb   : >> { %1333 = vadd.xlane.f32.xlu1 %v1332_v26  ;;  %v1338_v33 = vsel %vm1325_vm6, %v1297_v30, 0.0  ;;  %v1341_v38 = vsel %vm1325_vm6, %v1298_v34, 0.0  ;;  %v1299_v39 = vmul.f32 %v3712_v61, %v3871_v36  ;;  %v1300_v35 = vmul.f32 %v3714_v62, %v3871_v36  ;;  %v1105_v34 = vld [vmem:[%s1104_s13] sm:$0xff] }
 0x3cc   : >> { %v3900_v53 = vrot.slane %v1161_v50, %v3840_v9  ;;  %v1359_v54 = vsel %vm1325_vm6, %v1304_v52, 0.0  ;;  %v1163_v56 = vcombine.high %v1159_v46, %v1159_v46  ;;  %v1179_v16 = vcombine.high %v1171_v4, %v1171_v4 }
 0x3cd   : >> { %1330 = vadd.xlane.f32.xlu0 %v1329_v27  ;;  %v1344_v32 = vsel %vm1325_vm6, %v1299_v39, 0.0  ;;  %v1347_v44 = vsel %vm1325_vm6, %v1300_v35, 0.0  ;;  %v1309_v18 = vmul.f32 %v3712_v61, %v3925_v11  ;;  %v1303_v21 = vmul.f32 %v3712_v61, %v3894_v49 }
 0x3ce   : >> { %v1305_v55 = vmul.f32 %v3712_v61, %v3900_v53  ;;  %v1306_v60 = vmul.f32 %v3714_v62, %v3900_v53  ;;  %v3911_v63 = vrot.slane %v1163_v56, %v3840_v9  ;;  %v3931_v20 = vrot.slane %v1179_v16, %v3836_v7 }
 0x3cf   : >> { %1336 = vadd.xlane.f32.xlu1 %v1335_v29  ;;  %v1374_v22 = vsel %vm1325_vm6, %v1309_v18, 0.0  ;;  %v1310_v24 = vmul.f32 %v3714_v62, %v3925_v11  ;;  %v1356_v27 = vsel %vm1325_vm6, %v1303_v21, 0.0  ;;  %v1695_v39 = vrot.slane %v1105_v34, %v3836_v7 }
 0x3d0   : >> { %v1362_v59 = vsel %vm1325_vm6, %v1305_v55, 0.0  ;;  %v1365_v5 = vsel %vm1325_vm6, %v1306_v60, 0.0  ;;  %v1307_v6 = vmul.f32 %v3712_v61, %v3911_v63  ;;  %v1308_v10 = vmul.f32 %v3714_v62, %v3911_v63 }
 0x3d1   : >> { %v3940_v26 = vrot.slane %v3931_v20, %v3840_v9  ;;  %v1377_v29 = vsel %vm1325_vm6, %v1310_v24, 0.0  ;;  %v1164_v45 = vcombine.high %v1112_v58, %v1112_v58 }
 0x3d2   : >> { %v1368_v8 = vsel %vm1325_vm6, %v1307_v6, 0.0  ;;  %v1371_v17 = vsel %vm1325_vm6, %v1308_v10, 0.0  ;;  %v1688_v6 = vcombine.high %v1105_v34, %v1105_v34 }
 0x3d3   : >> { %1339 = vadd.xlane.f32.xlu1 %v1338_v33  ;;  %v1312_v28 = vmul.f32 %v3714_v62, %v3940_v26  ;;  %v1311_v30 = vmul.f32 %v3712_v61, %v3940_v26  ;;  %v3965_v50 = vrot.slane %v1164_v45, %v3836_v7 }
 0x3d5   : >> { %v1383_v31 = vsel %vm1325_vm6, %v1312_v28, 0.0  ;;  %v1380_v33 = vsel %vm1325_vm6, %v1311_v30, 0.0  ;;  %v1180_v58 = vcombine.high %v3965_v50, %v3965_v50 }
 0x3d7   : >> { %1342 = vadd.xlane.f32.xlu1 %v1341_v38  ;;  %v1930_v38 = vmul.f32 %v1108_v37, %v1105_v34  ;;  %v3978_v18 = vrot.slane %v1180_v58, %v3836_v7 }
 0x3d9   : >> { %v1941_v41 = vrot.slane %v1930_v38, %v3836_v7  ;;  %v1934_v34 = vcombine.high %v1930_v38, %v1930_v38 }
 0x3db   : >> { %1345 = vadd.xlane.f32.xlu1 %v1344_v32  ;;  %v1711_v32 = vrot.slane %v1695_v39, %v3836_v7  ;;  %v1957_v35 = vrot.slane %v1941_v41, %v3836_v7  ;;  %v1949_v46 = vcombine.high %v1941_v41, %v1941_v41 }
 0x3dd   : >> { %v1789_v43 = vrot.slane %v1711_v32, %v3840_v9  ;;  %v1971_v52 = vrot.slane %v1949_v46, %v3836_v7 }
 0x3df   : >> { %1348 = vadd.xlane.f32.xlu1 %v1347_v44  ;;  %v1703_v44 = vcombine.high %v1695_v39, %v1695_v39  ;;  %v1867_v4 = vmul.f32 %v1789_v43, %v3795_v14  ;;  %v1702_v39 = vrot.slane %v1688_v6, %v3836_v7 }
 0x3e1   : >> { %v1725_v48 = vrot.slane %v1703_v44, %v3836_v7  ;;  %v2181_v24 = vmul.f32 %v3476_v2, %v1867_v4 }
 0x3e3   : >> { %3276 = vrot.lane.b32.xlu0 %v3275_v40, %s3493_s30  ;;  %1351 = vadd.xlane.f32.xlu1 %v1350_v47  ;;  %v2035_v40 = vrot.slane %v1957_v35, %v3840_v9  ;;  %v1866_v47 = vmul.f32 %v1789_v43, %v3792_v13  ;;  %v1735_v30 = vcombine.high %v1725_v48, %v1725_v48 }
 0x3e4   : >> { %v1981_v43 = vcombine.high %v1971_v52, %v1971_v52 }
 0x3e5   : >> { %v2180_v56 = vmul.f32 %v3480_v3, %v1866_v47  ;;  %v1801_v47 = vrot.slane %v1735_v30, %v3840_v9 }
 0x3e7   : >> { %1354 = vadd.xlane.f32.xlu1 %v1353_v51 }
 0x3eb   : >> { %1360 = vadd.xlane.f32.xlu1 %v1359_v54 }
 0x3ef   : >> { %1363 = vadd.xlane.f32.xlu1 %v1362_v59  ;;  %v1793_v59 = vrot.slane %v1725_v48, %v3840_v9  ;;  %v4006_v48 = vrot.slane %v1702_v39, %v3836_v7 }
 0x3f1   : >> { %v1869_v38 = vmul.f32 %v1793_v59, %v3795_v14 }
 0x3f3   : >> { %1366 = vadd.xlane.f32.xlu1 %v1365_v5  ;;  %v1733_v5 = vcombine.high %v1711_v32, %v1711_v32  ;;  %v1212_v32 = vcombine.high %v3978_v18, %v3978_v18 }
 0x3f7   : >> { %1369 = vadd.xlane.f32.xlu1 %v1368_v8  ;;  %v2039_v8 = vrot.slane %v1971_v52, %v3840_v9 }
 0x3fb   : >> { %1372 = vadd.xlane.f32.xlu1 %v1371_v17  ;;  %v1868_v17 = vmul.f32 %v1793_v59, %v3792_v13  ;;  %v2047_v59 = vrot.slane %v1981_v43, %v3840_v9 }
 0x3ff   : >> { %1375 = vadd.xlane.f32.xlu1 %v1374_v22  ;;  %v1979_v22 = vcombine.high %v1957_v35, %v1957_v35 }
 0x401   : >> { %v2043_v35 = vrot.slane %v1979_v22, %v3840_v9  ;;  %v1704_v22 = vcombine.high %v1702_v39, %v1702_v39  ;;  %v1873_v39 = vmul.f32 %v1801_v47, %v3795_v14 }
 0x402   : >> { %1357 = vadd.xlane.f32.xlu0 %v1356_v27 }
 0x403   : >> { %1378 = vadd.xlane.f32.xlu1 %v1377_v29  ;;  %v1797_v29 = vrot.slane %v1733_v5, %v3840_v9 }
 0x405   : >> { %v1870_v45 = vmul.f32 %v1797_v29, %v3792_v13  ;;  %v1871_v4 = vmul.f32 %v1797_v29, %v3795_v14 }
 0x406   : >> { %1384 = vadd.xlane.f32.xlu0 %v1383_v31 }
 0x407   : >> { %1381 = vadd.xlane.f32.xlu1 %v1380_v33 }
 0x452   : >> { %v1328_v51 = vpop.xlane.xlu0 %1327 }
 0x453   : >> { %v2112_v54 = vmul.f32 %v2035_v40, %v1328_v51 }
 0x454   : >> { %v1334_v55 = vpop.xlane.xlu1 %1333 }
 0x455   : >> { %v3974_v16 = vadd.f32 %v2180_v56, %v2112_v54  ;;  %v2114_v31 = vmul.f32 %v2039_v8, %v1334_v55  ;;  %v4013_v54 = vrot.slane %v1212_v32, %v3840_v9 }
 0x456   : >> { %v1331_v60 = vpop.xlane.xlu0 %1330 }
 0x457   : >> { %v2113_v3 = vmul.f32 %v2035_v40, %v1331_v60  ;;  %v2201_v37 = vmul.f32 %v3974_v16, %v1868_v17  ;;  %v1209_v60 = vcombine.high %v3918_v23, %v3918_v23  ;;  %v1805_v17 = vrot.slane %v4006_v48, %v3840_v9 }
 0x458   : >> { %v1337_v10 = vpop.xlane.xlu1 %1336 }
 0x459   : >> { %v3995_v44 = vadd.f32 %v2181_v24, %v2113_v3  ;;  %v4002_v40 = vadd.f32 %v2201_v37, %v2114_v31  ;;  %v2115_v55 = vmul.f32 %v2039_v8, %v1337_v10  ;;  %v1872_v10 = vmul.f32 %v1801_v47, %v3792_v13 }
 0x45a   : >> { %v3277_v21 = vpop.permute.xlu0 %3276  ;;  %v1874_v43 = vmul.f32 %v1805_v17, %v3792_v13 }
 0x45b   : >> { %v3981_v27 = vunpack.i.h.bf16 %v3277_v21  ;;  %v3983_v28 = vunpack.i.l.bf16 %v3277_v21  ;;  %v2202_v58 = vmul.f32 %v3995_v44, %v1869_v38  ;;  %v2223_v8 = vmul.f32 %v4002_v40, %v1870_v45 }
 0x45c   : >> { %v1340_v33 = vpop.xlane.xlu1 %1339 }
 0x45d   : >> { %v1431_v41 = vmul.f32 %v3981_v27, %v3844_v12  ;;  %v1430_v2 = vmul.f32 %v3983_v28, %v3844_v12  ;;  %v1948_v12 = vrot.slane %v1934_v34, %v3836_v7  ;;  %v1446_v51 = vmul.f32 %v3983_v28, %v3925_v11 }
 0x45e   : >> { %v1432_v52 = vmul.f32 %v3983_v28, %v3850_v19  ;;  %v2116_v56 = vmul.f32 %v2043_v35, %v1340_v33  ;;  %v1448_v21 = vmul.f32 %v3983_v28, %v3940_v26  ;;  %v1433_v23 = vmul.f32 %v3981_v27, %v3850_v19 }
 0x45f   : >> { %1496 = vrot.lane.b32.xlu0 %v1431_v41, %s3494_s15  ;;  %1494 = vrot.lane.b32.xlu1 %v1430_v2, %s3494_s15  ;;  %v4023_v6 = vrot.slane %v1948_v12, %v3836_v7  ;;  %v4035_v29 = vmul.f32 %v3981_v27, %v4013_v54  ;;  %v4037_v30 = vadd.f32 %v2202_v58, %v2115_v55 }
 0x460   : >> { %v1343_v46 = vpop.xlane.xlu1 %1342  ;;  %v4039_v31 = vadd.f32 %v2223_v8, %v2116_v56  ;;  %v4044_v33 = vrot.slane %v1209_v60, %v3840_v9  ;;  %v1950_v37 = vcombine.high %v1948_v12, %v1948_v12  ;;  %v1434_v2 = vmul.f32 %v3983_v28, %v3860_v25 }
 0x461   : >> { %v2117_v3 = vmul.f32 %v2043_v35, %v1343_v46  ;;  %v2224_v19 = vmul.f32 %v4037_v30, %v1871_v4  ;;  %v1447_v32 = vmul.f32 %v3981_v27, %v3925_v11  ;;  %v2051_v35 = vrot.slane %v4023_v6, %v3840_v9 }
 0x462   : >> { %v2245_v41 = vmul.f32 %v4039_v31, %v1872_v10  ;;  %v1732_v12 = vrot.slane %v1704_v22, %v3836_v7  ;;  %v1211_v11 = vcombine.high %v3931_v20, %v3931_v20  ;;  %v1875_v55 = vmul.f32 %v1805_v17, %v3795_v14 }
 0x463   : >> { %1526 = vrot.lane.b32.xlu0 %v1446_v51, %s3494_s15  ;;  %1498 = vrot.lane.b32.xlu1 %v1432_v52, %s3494_s15  ;;  %v4056_v45 = vadd.f32 %v2224_v19, %v2117_v3  ;;  %v4064_v51 = vrot.slane %v1950_v37, %v3836_v7  ;;  %v1449_v58 = vmul.f32 %v3981_v27, %v3940_v26 }
 0x464   : >> { %v1346_v5 = vpop.xlane.xlu1 %1345  ;;  %v4089_v26 = vrot.slane %v1211_v11, %v3840_v9  ;;  %v1734_v3 = vcombine.high %v4006_v48, %v4006_v48  ;;  %v1435_v22 = vmul.f32 %v3981_v27, %v3860_v25  ;;  %v1980_v19 = vcombine.high %v4023_v6, %v4023_v6  ;;  %v4108_v48 = vld [vmem:[%s1104_s13 + $0x10] sm:$0xff] }
 0x465   : >> { %v2118_v24 = vmul.f32 %v2047_v59, %v1346_v5  ;;  %v2246_v52 = vmul.f32 %v4056_v45, %v1873_v39  ;;  %v4078_v5 = vrot.slane %v1732_v12, %v3840_v9  ;;  %v4086_v10 = vrot.slane %v4064_v51, %v3840_v9 }
 0x466   : >> { %v4111_v39 = vrot.slane %v1734_v3, %v3840_v9  ;;  %v1194_v6 = vrot.slane %v3965_v50, %v3836_v7  ;;  %v4138_v50 = vrot.slane %v1980_v19, %v3840_v9 }
 0x467   : >> { %1530 = vrot.lane.b32.xlu0 %v1448_v21, %s3494_s15  ;;  %1500 = vrot.lane.b32.xlu1 %v1433_v23, %s3494_s15  ;;  %v4058_v46 = vadd.f32 %v2245_v41, %v2118_v24  ;;  %v1877_v17 = vmul.f32 %v4078_v5, %v3795_v14  ;;  %v1436_v23 = vmul.f32 %v3983_v28, %v3871_v36 }
 0x468   : >> { %v1349_v34 = vpop.xlane.xlu1 %1348  ;;  %v1452_v41 = vmul.f32 %v3983_v28, %v4089_v26  ;;  %v4132_v11 = vrot.slane %v1194_v6, %v3840_v9 }
 0x469   : >> { %v2119_v38 = vmul.f32 %v2047_v59, %v1349_v34  ;;  %v1450_v59 = vmul.f32 %v3983_v28, %v4044_v33  ;;  %v2267_v60 = vmul.f32 %v4058_v46, %v1874_v43  ;;  %v1744_v43 = vrot.slane %v4108_v48, %v3836_v7 }
 0x46b   : >> { %1502 = vrot.lane.b32.xlu0 %v1434_v2, %s3494_s15  ;;  %1528 = vrot.lane.b32.xlu1 %v1447_v32, %s3494_s15  ;;  %v4075_v4 = vadd.f32 %v2246_v52, %v2119_v38  ;;  %v1451_v2 = vmul.f32 %v3981_v27, %v4044_v33  ;;  %v1109_v32 = vld [vmem:[%s1107_s10 + $0x10] sm:$0xff] }
 0x46c   : >> { %v1352_v47 = vpop.xlane.xlu1 %1351  ;;  %v4135_v52 = vmul.f32 %v1109_v32, %v4108_v48  ;;  %v1440_v32 = vmul.f32 %v3983_v28, %v3894_v49 }
 0x46d   : >> { %v2120_v56 = vmul.f32 %v2051_v35, %v1352_v47  ;;  %v2268_v24 = vmul.f32 %v4075_v4, %v1875_v55  ;;  %v1736_v55 = vcombine.high %v1732_v12, %v1732_v12 }
 0x46f   : >> { %1534 = vrot.lane.b32.xlu0 %v1450_v59, %s3494_s15  ;;  %1532 = vrot.lane.b32.xlu1 %v1449_v58, %s3494_s15  ;;  %v4082_v20 = vadd.f32 %v2267_v60, %v2120_v56  ;;  %v1438_v56 = vmul.f32 %v3983_v28, %v3882_v42  ;;  %v1437_v59 = vmul.f32 %v3981_v27, %v3871_v36 }
 0x470   : >> { %v1355_v8 = vpop.xlane.xlu1 %1354  ;;  %v1879_v58 = vmul.f32 %v4111_v39, %v3795_v14  ;;  %v4149_v60 = vrot.slane %v1744_v43, %v3836_v7  ;;  %v1817_v3 = vrot.slane %v1736_v55, %v3840_v9 }
 0x471   : >> { %v2121_v21 = vmul.f32 %v2051_v35, %v1355_v8  ;;  %v1982_v8 = vcombine.high %v4064_v51, %v4064_v51 }
 0x472   : >> { %v4166_v51 = vrot.slane %v4149_v60, %v3840_v9 }
 0x473   : >> { %1506 = vrot.lane.b32.xlu0 %v1436_v23, %s3494_s15  ;;  %1504 = vrot.lane.b32.xlu1 %v1435_v22, %s3494_s15  ;;  %v4102_v34 = vadd.f32 %v2268_v24, %v2121_v21  ;;  %v1454_v21 = vmul.f32 %v3983_v28, %v4132_v11  ;;  %v1453_v23 = vmul.f32 %v3981_v27, %v4089_v26 }
 0x474   : >> { %v1361_v37 = vpop.xlane.xlu1 %1360  ;;  %v1752_v24 = vcombine.high %v1744_v43, %v1744_v43  ;;  %v1881_v43 = vmul.f32 %v1817_v3, %v3795_v14  ;;  %v1882_v55 = vmul.f32 %v4166_v51, %v3792_v13 }
 0x475   : >> { %v2123_v25 = vmul.f32 %v4086_v10, %v1361_v37  ;;  %v2290_v35 = vmul.f32 %v4102_v34, %v1877_v17  ;;  %v1990_v17 = vrot.slane %v4135_v52, %v3836_v7 }
 0x477   : >> { %1538 = vrot.lane.b32.xlu0 %v1452_v41, %s3494_s15  ;;  %1536 = vrot.lane.b32.xlu1 %v1451_v2, %s3494_s15  ;;  %v4127_v38 = vadd.f32 %v2290_v35, %v2123_v25  ;;  %v2063_v25 = vrot.slane %v1982_v8, %v3840_v9  ;;  %v4173_v41 = vrot.slane %v3978_v18, %v3840_v9 }
 0x478   : >> { %v4129_v47 = vpop.xlane.xlu1 %1363  ;;  %v4176_v2 = vrot.slane %v1990_v17, %v3836_v7  ;;  %v1439_v35 = vmul.f32 %v3981_v27, %v3882_v42  ;;  %v4188_v18 = vrot.slane %v1752_v24, %v3836_v7 }
 0x479   : >> { %v2312_v22 = vmul.f32 %v4127_v38, %v1879_v58  ;;  %v1456_v8 = vmul.f32 %v3983_v28, %v4173_v41 }
 0x47a   : >> { %v4192_v58 = vrot.slane %v4176_v2, %v3840_v9 }
 0x47b   : >> { %1510 = vrot.lane.b32.xlu0 %v1438_v56, %s3494_s15  ;;  %1508 = vrot.lane.b32.xlu1 %v1437_v59, %s3494_s15  ;;  %v1210_v59 = vcombine.high %v1194_v6, %v1194_v6  ;;  %v2182_v6 = vmul.f32 %v3472_v1, %v1882_v55 }
 0x47c   : >> { %v1367_v12 = vpop.xlane.xlu1 %1366 }
 0x47d   : >> { %v2125_v36 = vmul.f32 %v4138_v50, %v1367_v12  ;;  %v1998_v12 = vcombine.high %v1990_v17, %v1990_v17 }
 0x47f   : >> { %1542 = vrot.lane.b32.xlu0 %v1454_v21, %s3494_s15  ;;  %1540 = vrot.lane.b32.xlu1 %v1453_v23, %s3494_s15  ;;  %v4168_v37 = vadd.f32 %v2312_v22, %v2125_v36  ;;  %v1455_v36 = vmul.f32 %v3981_v27, %v4132_v11  ;;  %v4204_v23 = vrot.slane %v4188_v18, %v3840_v9 }
 0x480   : >> { %v1370_v19 = vpop.xlane.xlu1 %1369  ;;  %v4209_v22 = vrot.slane %v1210_v59, %v3840_v9  ;;  %v4219_v55 = vrot.slane %v1998_v12, %v3836_v7  ;;  %v1878_v12 = vmul.f32 %v4111_v39, %v3792_v13 }
 0x481   : >> { %v2334_v21 = vmul.f32 %v4168_v37, %v1881_v43  ;;  %v1441_v43 = vmul.f32 %v3981_v27, %v3894_v49 }
 0x483   : >> { %1514 = vrot.lane.b32.xlu0 %v1440_v32, %s3494_s15  ;;  %1512 = vrot.lane.b32.xlu1 %v1439_v35, %s3494_s15  ;;  %v1876_v32 = vmul.f32 %v4078_v5, %v3792_v13  ;;  %v1442_v35 = vmul.f32 %v3983_v28, %v3900_v53  ;;  %v1884_v5 = vmul.f32 %v4204_v23, %v3792_v13 }
 0x484   : >> { %v1373_v56 = vpop.xlane.xlu1 %1372 }
 0x485   : >> { %v2127_v42 = vmul.f32 %v2063_v25, %v1373_v56  ;;  %v2289_v49 = vmul.f32 %v4082_v20, %v1876_v32 }
 0x487   : >> { %1546 = vrot.lane.b32.xlu0 %v1456_v8, %s3494_s15  ;;  %1544 = vrot.lane.b32.xlu1 %v1455_v36, %s3494_s15  ;;  %v4206_v17 = vadd.f32 %v2334_v21, %v2127_v42   ;;  %v1458_v36 = vmul.f32 %v3983_v28, %v4209_v22  ;;  %v1457_v21 = vmul.f32 %v3981_v27, %v4173_v41 }
 0x488   : >> { %v1376_v24 = vpop.xlane.xlu1 %1375 }
 0x489   : >> { %v2128_v1 = vmul.f32 %v4192_v58, %v1376_v24 }
 0x48b   : >> { %1518 = vrot.lane.b32.xlu0 %v1442_v35, %s3494_s15  ;;  %v1358_v56 = vpop.xlane.xlu0 %1357  ;;  %1516 = vrot.lane.b32.xlu1 %v1441_v43, %s3494_s15  ;;  %v4223_v59 = vadd.f32 %v2182_v6, %v2128_v1  ;;  %v4239_v6 = vrot.slane %v4219_v55, %v3840_v9  ;;  %v1880_v43 = vmul.f32 %v1817_v3, %v3792_v13 }
 0x48c   : >> { %v2122_v42 = vmul.f32 %v4086_v10, %v1358_v56  ;;  %v4228_v8 = vpop.xlane.xlu1 %1378  ;;  %v2124_v10 = vmul.f32 %v4138_v50, %v4129_v47  ;;  %v1444_v1 = vmul.f32 %v3983_v28, %v3911_v63  ;;  %v1443_v56 = vmul.f32 %v3981_v27, %v3900_v53 }
 0x48d   : >> { %v2203_v39 = vmul.f32 %v4223_v59, %v1884_v5  ;;  %v2126_v50 = vmul.f32 %v2063_v25, %v1370_v19  ;;  %v1460_v3 = vmul.f32 %v3983_v28, %v4013_v54  ;;  %v1445_v19 = vmul.f32 %v3981_v27, %v3911_v63 }
 0x48e   : >> { %v4243_v24 = vadd.f32 %v2289_v49, %v2122_v42  ;;  %v1313_v28 = vmul.f32 %v3712_v61, %v4044_v33 }
 0x48f   : >> { %1550 = vrot.lane.b32.xlu0 %v1458_v36, %s3494_s15  ;;  %1548 = vrot.lane.b32.xlu1 %v1457_v21, %s3494_s15  ;;  %v1315_v36 = vmul.f32 %v3712_v61, %v4089_v26 }
 0x490   : >> { %v1382_v32 = vpop.xlane.xlu1 %1381  ;;  %v2311_v35 = vmul.f32 %v4243_v24, %v1878_v12  ;;  %v1459_v12 = vmul.f32 %v3981_v27, %v4209_v22  ;;  %v1386_v25 = vsel %vm1325_vm6, %v1313_v28, 0.0  ;;  %v1318_v27 = vmul.f32 %v3714_v62, %v4132_v11 }
 0x491   : >> { %v2130_v47 = vmul.f32 %v4239_v6, %v1382_v32  ;;  %v1392_v21 = vsel %vm1325_vm6, %v1315_v36, 0.0  ;;  %v1320_v32 = vmul.f32 %v3714_v62, %v4173_v41 }
 0x492   : >> { %v4255_v42 = vadd.f32 %v2311_v35, %v2124_v10  ;;  %v1316_v10 = vmul.f32 %v3714_v62, %v4089_v26  ;;  %v1317_v26 = vmul.f32 %v3712_v61, %v4132_v11 }
 0x493   : >> { %1522 = vrot.lane.b32.xlu0 %v1444_v1, %s3494_s15  ;;  %1520 = vrot.lane.b32.xlu1 %v1443_v56, %s3494_s15  ;;  %v4259_v5 = vadd.f32 %v2203_v39, %v2130_v47  ;;  %v1401_v39 = vsel %vm1325_vm6, %v1318_v27, 0.0  ;;  %v1322_v1 = vmul.f32 %v3714_v62, %v4209_v22  ;;  %v1319_v56 = vmul.f32 %v3712_v61, %v4173_v41 }
 0x494   : >> { %v2333_v49 = vmul.f32 %v4255_v42, %v1880_v43  ;;  %v1395_v63 = vsel %vm1325_vm6, %v1316_v10, 0.0  ;;  %v1407_v43 = vsel %vm1325_vm6, %v1320_v32, 0.0 }
 0x495   : >> { %v1413_v47 = vsel %vm1325_vm6, %v1322_v1, 0.0  ;;  %v1404_v11 = vsel %vm1325_vm6, %v1319_v56, 0.0 }
 0x496   : >> { %v4266_v53 = vadd.f32 %v2333_v49, %v2126_v50   ;;  %v1324_v50 = vmul.f32 %v3714_v62, %v4013_v54  ;;  %v1321_v49 = vmul.f32 %v3712_v61, %v4209_v22 }
 0x497   : >> { %1554 = vrot.lane.b32.xlu0 %v1460_v3, %s3494_s15  ;;  %1552 = vrot.lane.b32.xlu1 %v1459_v12, %s3494_s15  ;;  %v4306_v3 = vpop.xlane.xlu0 %1384 }
 0x498   : >> { %v1419_v12 = vsel %vm1325_vm6, %v1324_v50, 0.0  ;;  %v1410_v41 = vsel %vm1325_vm6, %v1321_v49, 0.0 }
 0x49b   : >> { %1524 = vrot.lane.b32.xlu1 %v1445_v19, %s3494_s15  ;;  %v1323_v19 = vmul.f32 %v3712_v61, %v4013_v54  ;;  %v3288_v61 = vld [vmem:[%s3665_s8 + $0x18] sm:$0xff] (%p1095_p4)  }
 0x49d   : >> { %v1416_v28 = vsel %vm1325_vm6, %v1323_v19, 0.0 }
 0x49f   : >> { %1556 = vrot.lane.b32.xlu1 %v4035_v29, %s3494_s15  ;;  %v1314_v29 = vmul.f32 %v3714_v62, %v4044_v33  ;;  %v1398_v33 = vsel %vm1325_vm6, %v1317_v26, 0.0  ;;  %v2586_v62 = vld [vmem:[#allocation4 + $0x18] sm:$0xff] (%p1095_p4) }
 0x4a1   : >> { %v1389_v35 = vsel %vm1325_vm6, %v1314_v29, 0.0 }
 0x4b6   : >> { %1387 = vadd.xlane.f32.xlu0 %v1386_v25 }
 0x4ba   : >> { %1393 = vadd.xlane.f32.xlu0 %v1392_v21 }
 0x4be   : >> { %1396 = vadd.xlane.f32.xlu0 %v1395_v63 }
 0x4c2   : >> { %1402 = vadd.xlane.f32.xlu0 %v1401_v39 }
 0x4c3   : >> { %1390 = vadd.xlane.f32.xlu1 %v1389_v35 }
 0x4c6   : >> { %1408 = vadd.xlane.f32.xlu0 %v1407_v43 }
 0x4c7   : >> { %1399 = vadd.xlane.f32.xlu1 %v1398_v33 }
 0x4ca   : >> { %1414 = vadd.xlane.f32.xlu0 %v1413_v47 }
 0x4cb   : >> { %1405 = vadd.xlane.f32.xlu1 %v1404_v11 }
 0x4ce   : >> { %1420 = vadd.xlane.f32.xlu0 %v1419_v12 }
 0x4cf   : >> { %1411 = vadd.xlane.f32.xlu1 %v1410_v41 }
 0x4d1   : >> { %v1497_v25 = vpop.permute.xlu0 %1496  ;;  %v1495_v36 = vpop.permute.xlu1 %1494 }
 0x4d2   : >> { %v1593_v21 = vsel %vm1325_vm6, %v1497_v25, 0.0  ;;  %v1590_v63 = vsel %vm1325_vm6, %v1495_v36, 0.0 }
 0x4d3   : >> { %1594 = vadd.xlane.f32.xlu0 %v1593_v21  ;;  %1417 = vadd.xlane.f32.xlu1 %v1416_v28 }
 0x4d5   : >> { %v1527_v22 = vpop.permute.xlu0 %1526  ;;  %v1499_v10 = vpop.permute.xlu1 %1498 }
 0x4d6   : >> { %v1596_v39 = vsel %vm1325_vm6, %v1499_v10, 0.0  ;;  %v1638_v26 = vsel %vm1325_vm6, %v1527_v22, 0.0 }
 0x4d7   : >> { %1591 = vadd.xlane.f32.xlu1 %v1590_v63 }
 0x4d9   : >> { %v1531_v27 = vpop.permute.xlu0 %1530  ;;  %v1501_v29 = vpop.permute.xlu1 %1500 }
 0x4da   : >> { %v1599_v54 = vsel %vm1325_vm6, %v1501_v29, 0.0  ;;  %v1644_v56 = vsel %vm1325_vm6, %v1531_v27, 0.0 }
 0x4db   : >> { %1597 = vadd.xlane.f32.xlu1 %v1596_v39  ;;  %1600 = vadd.xlane.f32.xlu0 %v1599_v54 }
 0x4dd   : >> { %v1503_v32 = vpop.permute.xlu0 %1502  ;;  %v1529_v35 = vpop.permute.xlu1 %1528 }
 0x4de   : >> { %v1641_v43 = vsel %vm1325_vm6, %v1529_v35, 0.0  ;;  %v1602_v49 = vsel %vm1325_vm6, %v1503_v32, 0.0 }
 0x4df   : >> { %1639 = vadd.xlane.f32.xlu1 %v1638_v26  ;;  %1642 = vadd.xlane.f32.xlu0 %v1641_v43 }
 0x4e1   : >> { %v1535_v1 = vpop.permute.xlu0 %1534  ;;  %v1533_v33 = vpop.permute.xlu1 %1532 }
 0x4e2   : >> { %v1647_v47 = vsel %vm1325_vm6, %v1533_v33, 0.0  ;;  %v1650_v28 = vsel %vm1325_vm6, %v1535_v1, 0.0 }
 0x4e3   : >> { %1645 = vadd.xlane.f32.xlu1 %v1644_v56  ;;  %1648 = vadd.xlane.f32.xlu0 %v1647_v47 }
 0x4e5   : >> { %v1507_v50 = vpop.permute.xlu0 %1506  ;;  %v1505_v11 = vpop.permute.xlu1 %1504 }
 0x4e6   : >> { %v1605_v12 = vsel %vm1325_vm6, %v1505_v11, 0.0  ;;  %v1608_v22 = vsel %vm1325_vm6, %v1507_v50, 0.0 }
 0x4e7   : >> { %1603 = vadd.xlane.f32.xlu1 %v1602_v49  ;;  %1606 = vadd.xlane.f32.xlu0 %v1605_v12 }
 0x4e9   : >> { %v1539_v41 = vpop.permute.xlu0 %1538  ;;  %v1537_v19 = vpop.permute.xlu1 %1536 }
 0x4ea   : >> { %v1653_v25 = vsel %vm1325_vm6, %v1537_v19, 0.0  ;;  %v1656_v29 = vsel %vm1325_vm6, %v1539_v41, 0.0 }
 0x4eb   : >> { %1651 = vadd.xlane.f32.xlu1 %v1650_v28  ;;  %1654 = vadd.xlane.f32.xlu0 %v1653_v25 }
 0x4ed   : >> { %v1511_v36 = vpop.permute.xlu0 %1510  ;;  %v1509_v21 = vpop.permute.xlu1 %1508 }
 0x4ee   : >> { %v1611_v10 = vsel %vm1325_vm6, %v1509_v21, 0.0  ;;  %v1614_v35 = vsel %vm1325_vm6, %v1511_v36, 0.0 }
 0x4ef   : >> { %1609 = vadd.xlane.f32.xlu1 %v1608_v22  ;;  %1612 = vadd.xlane.f32.xlu0 %v1611_v10 }
 0x4f1   : >> { %v1543_v63 = vpop.permute.xlu0 %1542  ;;  %v1541_v27 = vpop.permute.xlu1 %1540 }
 0x4f2   : >> { %v1659_v39 = vsel %vm1325_vm6, %v1541_v27, 0.0  ;;  %v1662_v33 = vsel %vm1325_vm6, %v1543_v63, 0.0 }
 0x4f3   : >> { %1657 = vadd.xlane.f32.xlu1 %v1656_v29  ;;  %1660 = vadd.xlane.f32.xlu0 %v1659_v39 }
 0x4f5   : >> { %v1515_v54 = vpop.permute.xlu0 %1514  ;;  %v1513_v32 = vpop.permute.xlu1 %1512 }
 0x4f6   : >> { %v1617_v26 = vsel %vm1325_vm6, %v1513_v32, 0.0  ;;  %v1620_v11 = vsel %vm1325_vm6, %v1515_v54, 0.0 }
 0x4f7   : >> { %1615 = vadd.xlane.f32.xlu1 %v1614_v35  ;;  %1618 = vadd.xlane.f32.xlu0 %v1617_v26 }
 0x4f9   : >> { %v1547_v43 = vpop.permute.xlu0 %1546  ;;  %v1545_v1 = vpop.permute.xlu1 %1544 }
 0x4fa   : >> { %v1665_v56 = vsel %vm1325_vm6, %v1545_v1, 0.0  ;;  %v1668_v41 = vsel %vm1325_vm6, %v1547_v43, 0.0  ;;  %v1782_v1 = vcombine.high %v4149_v60, %v4149_v60 }
 0x4fb   : >> { %1663 = vadd.xlane.f32.xlu1 %v1662_v33  ;;  %1666 = vadd.xlane.f32.xlu0 %v1665_v56  ;;  %v2028_v33 = vcombine.high %v4176_v2, %v4176_v2 }
 0x4fc   : >> { %v1829_v56 = vrot.slane %v1782_v1, %v3840_v9 }
 0x4fd   : >> { %v1519_v47 = vpop.permute.xlu0 %1518  ;;  %v1517_v50 = vpop.permute.xlu1 %1516 }
 0x4fe   : >> { %v1623_v49 = vsel %vm1325_vm6, %v1517_v50, 0.0  ;;  %v1626_v36 = vsel %vm1325_vm6, %v1519_v47, 0.0  ;;  %v1784_v47 = vcombine.high %v4188_v18, %v4188_v18  ;;  %v4353_v50 = vrot.slane %v2028_v33, %v3840_v9 }
 0x4ff   : >> { %1621 = vadd.xlane.f32.xlu1 %v1620_v11  ;;  %1624 = vadd.xlane.f32.xlu0 %v1623_v49  ;;  %v2030_v11 = vcombine.high %v4219_v55, %v4219_v55  ;;  %v1886_v49 = vmul.f32 %v1829_v56, %v3792_v13  ;;  %v2129_v33 = vmul.f32 %v4192_v58, %v4228_v8 }
 0x501   : >> { %v1549_v12 = vpop.permute.xlu1 %1548  ;;  %v1551_v28 = vpop.permute.xlu0 %1550  ;;  %v4363_v2 = vrot.slane %v2030_v11, %v3840_v9 }
 0x502   : >> { %v1671_v19 = vsel %vm1325_vm6, %v1549_v12, 0.0  ;;  %v1674_v63 = vsel %vm1325_vm6, %v1551_v28, 0.0  ;;  %v4359_v12 = vrot.slane %v1784_v47, %v3840_v9 }
 0x503   : >> { %1669 = vadd.xlane.f32.xlu1 %v1668_v41  ;;  %1672 = vadd.xlane.f32.xlu0 %v1671_v19  ;;  %v2225_v19 = vmul.f32 %v4259_v5, %v1886_v49 }
 0x504   : >> { %v1888_v18 = vmul.f32 %v4359_v12, %v3792_v13 }
 0x505   : >> { %v1521_v25 = vpop.permute.xlu1 %1520  ;;  %v1523_v22 = vpop.permute.xlu0 %1522 }
 0x506   : >> { %v1629_v21 = vsel %vm1325_vm6, %v1521_v25, 0.0  ;;  %v1632_v39 = vsel %vm1325_vm6, %v1523_v22, 0.0 }
 0x507   : >> { %1627 = vadd.xlane.f32.xlu1 %v1626_v36  ;;  %1630 = vadd.xlane.f32.xlu0 %v1629_v21 }
 0x509   : >> { %v1553_v10 = vpop.permute.xlu1 %1552  ;;  %v1555_v32 = vpop.permute.xlu0 %1554 }
 0x50a   : >> { %v1677_v27 = vsel %vm1325_vm6, %v1553_v10, 0.0  ;;  %v1680_v26 = vsel %vm1325_vm6, %v1555_v32, 0.0 }
 0x50b   : >> { %1675 = vadd.xlane.f32.xlu1 %v1674_v63  ;;  %1678 = vadd.xlane.f32.xlu0 %v1677_v27 }
 0x50d   : >> { %v1525_v29 = vpop.permute.xlu1 %1524 }
 0x50e   : >> { %v1635_v54 = vsel %vm1325_vm6, %v1525_v29, 0.0 }
 0x50f   : >> { %1633 = vadd.xlane.f32.xlu1 %v1632_v39  ;;  %1636 = vadd.xlane.f32.xlu0 %v1635_v54 }
 0x511   : >> { %v1557_v35 = vpop.permute.xlu1 %1556 }
 0x512   : >> { %v1683_v43 = vsel %vm1325_vm6, %v1557_v35, 0.0 }
 0x513   : >> { %1681 = vadd.xlane.f32.xlu1 %v1680_v26  ;;  %1684 = vadd.xlane.f32.xlu0 %v1683_v43  ;;  %v1883_v26 = vmul.f32 %v4166_v51, %v3795_v14 }
 0x515   : >> { %v2183_v47 = vmul.f32 %v3468_v0, %v1883_v26 }
 0x53f   : >> { %v1388_v60 = vpop.xlane.xlu0 %1387 }
 0x540   : >> { %v2132_v41 = vmul.f32 %v4353_v50, %v1388_v60 }
 0x542   : >> { %v4368_v28 = vadd.f32 %v2225_v19, %v2132_v41  ;;  %v2191_v19 = vadd.f32 %v2183_v47, %v2129_v33 }
 0x543   : >> { %v1394_v25 = vpop.xlane.xlu0 %1393 }
 0x544   : >> { %v2134_v55 = vmul.f32 %v4363_v2, %v1394_v25  ;;  %v2247_v36 = vmul.f32 %v4368_v28, %v1888_v18  ;;  %v1885_v18 = vmul.f32 %v4204_v23, %v3795_v14 }
 0x546   : >> { %v4372_v21 = vadd.f32 %v2247_v36, %v2134_v55  ;;  %v1737_v55 = vcombine.high %v4108_v48, %v4108_v48  ;;  %v2204_v26 = vmul.f32 %v2191_v19, %v1885_v18 }
 0x547   : >> { %v4374_v22 = vpop.xlane.xlu0 %1396 }
 0x548   : >> { %v1751_v23 = vrot.slane %v1737_v55, %v3836_v7 }
 0x54a   : >> { %v4413_v18 = vrot.slane %v1751_v23, %v3836_v7 }
 0x54b   : >> { %v4376_v10 = vpop.xlane.xlu0 %1402 }
 0x54c   : >> { %v1391_v63 = vpop.xlane.xlu1 %1390 }
 0x54f   : >> { %v4378_v27 = vpop.xlane.xlu0 %1408 }
 0x550   : >> { %v4380_v29 = vpop.xlane.xlu1 %1399 }
 0x553   : >> { %v4382_v39 = vpop.xlane.xlu0 %1414 }
 0x554   : >> { %v4384_v54 = vpop.xlane.xlu1 %1405 }
 0x557   : >> { %v4386_v32 = vpop.xlane.xlu0 %1420 }
 0x558   : >> { %v4388_v35 = vpop.xlane.xlu1 %1411 }
 0x55c   : >> { %v4392_v43 = vpop.xlane.xlu1 %1417  ;;  %v1595_v1 = vpop.xlane.xlu0 %1594 }
 0x55d   : >> { %v2383_v49 = vmul.f32 %v3995_v44, %v1595_v1  ;;  %v2131_v44 = vmul.f32 %v4239_v6, %v4306_v3 }
 0x560   : >> { %v1592_v11 = vpop.xlane.xlu1 %1591 }
 0x561   : >> { %v2382_v60 = vmul.f32 %v3974_v16, %v1592_v11 }
 0x563   : >> { %v2414_v41 = vadd.f32 %v2383_v49, %v2382_v60 }
 0x564   : >> { %v1601_v25 = vpop.xlane.xlu0 %1600  ;;  %v1598_v51 = vpop.xlane.xlu1 %1597 }
 0x565   : >> { %v2415_v36 = vrot.slane %v2414_v41, 4  ;;  %v2385_v58 = vmul.f32 %v4037_v30, %v1601_v25  ;;  %v2384_v0 = vmul.f32 %v4002_v40, %v1598_v51  ;;  %v2213_v25 = vadd.f32 %v2204_v26, %v2131_v44 }
 0x566   : >> { %v1983_v40 = vcombine.high %v4135_v52, %v4135_v52 }
 0x567   : >> { %v2416_v8 = vadd.f32 %v2415_v36, %v2414_v41  ;;  %v2421_v16 = vadd.f32 %v2385_v58, %v2384_v0  ;;  %v1887_v41 = vmul.f32 %v1829_v56, %v3795_v14  ;;  %v1837_v56 = vrot.slane %v4413_v18, %v3840_v9 }
 0x568   : >> { %v1643_v1 = vpop.xlane.xlu0 %1642  ;;  %v1640_v33 = vpop.xlane.xlu1 %1639 }
 0x569   : >> { %v2417_v47 = vrot.slane %v2416_v8, 2  ;;  %v2422_v11 = vrot.slane %v2421_v16, 4  ;;  %v2399_v49 = vmul.f32 %v2191_v19, %v1643_v1  ;;  %v2398_v48 = vmul.f32 %v4223_v59, %v1640_v33 }
 0x56a   : >> { %v2133_v59 = vmul.f32 %v4353_v50, %v1391_v63  ;;  %v2226_v1 = vmul.f32 %v2213_v25, %v1887_v41 }
 0x56b   : >> { %v2418_v60 = vadd.f32 %v2417_v47, %v2416_v8  ;;  %v2423_v57 = vadd.f32 %v2422_v11, %v2421_v16  ;;  %v2470_v30 = vadd.f32 %v2399_v49, %v2398_v48  ;;  %v1997_v8 = vrot.slane %v1983_v40, %v3836_v7 }
 0x56c   : >> { %v1649_v6 = vpop.xlane.xlu0 %1648  ;;  %v1646_v3 = vpop.xlane.xlu1 %1645  ;;  %v2235_v40 = vadd.f32 %v2226_v1, %v2133_v59 }
 0x56d   : >> { %v2424_v51 = vrot.slane %v2423_v57, 2  ;;  %v2471_v55 = vrot.slane %v2470_v30, 4  ;;  %v2401_v36 = vmul.f32 %v2213_v25, %v1649_v6  ;;  %v2400_v19 = vmul.f32 %v4259_v5, %v1646_v3 }
 0x56e   : >> { %v2419_v58 = vrot.slane %v2418_v60, 1  ;;  %v1999_v49 = vcombine.high %v1997_v8, %v1997_v8 }
 0x56f   : >> { %v2425_v0 = vadd.f32 %v2424_v51, %v2423_v57  ;;  %v2472_v44 = vadd.f32 %v2471_v55, %v2470_v30  ;;  %v2477_v52 = vadd.f32 %v2401_v36, %v2400_v19  ;;  %v1889_v57 = vmul.f32 %v4359_v12, %v3795_v14 }
 0x570   : >> { %v1607_v16 = vpop.xlane.xlu0 %1606  ;;  %v1604_v26 = vpop.xlane.xlu1 %1603  ;;  %v2420_v63 = vadd.f32 %v2419_v58, %v2418_v60  ;;  %v1753_v51 = vcombine.high %v1751_v23, %v1751_v23  ;;  %v4429_v19 = vrot.slane %v1999_v49, %v3836_v7 }
 0x571   : >> { %v2426_v33 = vrot.slane %v2425_v0, 1  ;;  %v2473_v47 = vrot.slane %v2472_v44, 2  ;;  %v2387_v11 = vmul.f32 %v4056_v45, %v1607_v16  ;;  %v2386_v5 = vmul.f32 %v4039_v31, %v1604_v26 }
 0x572   : >> { %v2478_v50 = vrot.slane %v2477_v52, 4  ;;  %v4426_v31 = vrot.slane %v1997_v8, %v3836_v7  ;;  %v2248_v59 = vmul.f32 %v2235_v40, %v1889_v57  ;;  %v4434_v1 = vrot.slane %v1753_v51, %v3836_v7 }
 0x573   : >> { %v2427_v48 = vadd.f32 %v2426_v33, %v2425_v0  ;;  %v2428_v30 = vadd.f32 %v2387_v11, %v2386_v5  ;;  %v2474_v25 = vadd.f32 %v2473_v47, %v2472_v44  ;;  %v1890_v0 = vmul.f32 %v1837_v56, %v3792_v13 }
 0x574   : >> { %v2479_v6 = vadd.f32 %v2478_v50, %v2477_v52  ;;  %v1655_v3 = vpop.xlane.xlu0 %1654  ;;  %v1652_v41 = vpop.xlane.xlu1 %1651  ;;  %v2135_v8 = vmul.f32 %v4363_v2, %v4374_v22  ;;  %v2083_v11 = vrot.slane %v4426_v31, %v3840_v9  ;;  %v2087_v5 = vrot.slane %v4429_v19, %v3840_v9 }
 0x575   : >> { %v2543_v55 = vsel %vm2542_vm7, %v2427_v48, %v2420_v63  ;;  %v2429_v45 = vrot.slane %v2428_v30, 4  ;;  %v2403_v36 = vmul.f32 %v2235_v40, %v1655_v3  ;;  %v2402_v60 = vmul.f32 %v4368_v28, %v1652_v41 }
 0x576   : >> { %v2480_v12 = vrot.slane %v2479_v6, 2  ;;  %v2475_v44 = vrot.slane %v2474_v25, 1  ;;  %v2257_v7 = vadd.f32 %v2248_v59, %v2135_v8  ;;  %v1891_v48 = vmul.f32 %v1837_v56, %v3795_v14 }
 0x577   : >> { %v2430_v58 = vadd.f32 %v2429_v45, %v2428_v30  ;;  %v2484_v23 = vadd.f32 %v2403_v36, %v2402_v60  ;;  %v2136_v45 = vmul.f32 %v2083_v11, %v4380_v29  ;;  %v2137_v59 = vmul.f32 %v2083_v11, %v4376_v10 }
 0x578   : >> { %v2481_v52 = vadd.f32 %v2480_v12, %v2479_v6  ;;  %v1613_v16 = vpop.xlane.xlu0 %1612  ;;  %v1610_v26 = vpop.xlane.xlu1 %1609  ;;  %v2476_v30 = vadd.f32 %v2475_v44, %v2474_v25  ;;  %v2029_v44 = vcombine.high %v4426_v31, %v4426_v31 }
 0x579   : >> { %v2431_v33 = vrot.slane %v2430_v58, 2  ;;  %v2389_v47 = vmul.f32 %v4075_v4, %v1613_v16  ;;  %v2388_v28 = vmul.f32 %v4058_v46, %v1610_v26  ;;  %v2485_v50 = vrot.slane %v2484_v23, 4 }
 0x57a   : >> { %v2482_v49 = vrot.slane %v2481_v52, 1  ;;  %v1841_v46 = vrot.slane %v4434_v1, %v3840_v9  ;;  %v2269_v26 = vmul.f32 %v4372_v21, %v1890_v0 }
 0x57b   : >> { %v2432_v57 = vadd.f32 %v2431_v33, %v2430_v58  ;;  %v2435_v63 = vadd.f32 %v2389_v47, %v2388_v28  ;;  %v2486_v22 = vadd.f32 %v2485_v50, %v2484_v23  ;;  %v2270_v58 = vmul.f32 %v2257_v7, %v1891_v48 }
 0x57c   : >> { %v2483_v2 = vadd.f32 %v2482_v49, %v2481_v52  ;;  %v1661_v40 = vpop.xlane.xlu0 %1660  ;;  %v1658_v4 = vpop.xlane.xlu1 %1657  ;;  %v2278_v50 = vadd.f32 %v2269_v26, %v2136_v45  ;;  %v1892_v10 = vmul.f32 %v1841_v46, %v3792_v13  ;;  %v1783_v48 = vcombine.high %v4413_v18, %v4413_v18 }
 0x57d   : >> { %v2433_v6 = vrot.slane %v2432_v57, 1  ;;  %v2436_v3 = vrot.slane %v2435_v63, 4  ;;  %v2405_v41 = vmul.f32 %v2257_v7, %v1661_v40  ;;  %v2404_v51 = vmul.f32 %v4372_v21, %v1658_v4 }
 0x57e   : >> { %v2556_v36 = vsel %vm2542_vm7, %v2483_v2, %v2476_v30  ;;  %v2487_v12 = vrot.slane %v2486_v22, 2  ;;  %v2279_v31 = vadd.f32 %v2270_v58, %v2137_v59  ;;  %v2139_v45 = vmul.f32 %v2087_v5, %v4378_v27 }
 0x57f   : >> { %v2434_v56 = vadd.f32 %v2433_v6, %v2432_v57  ;;  %v2437_v25 = vadd.f32 %v2436_v3, %v2435_v63  ;;  %v2491_v60 = vadd.f32 %v2405_v41, %v2404_v51  ;;  %v1893_v63 = vmul.f32 %v1841_v46, %v3795_v14 }
 0x580   : >> { %v2488_v52 = vadd.f32 %v2487_v12, %v2486_v22  ;;  %v1619_v23 = vpop.xlane.xlu0 %1618  ;;  %v1616_v16 = vpop.xlane.xlu1 %1615  ;;  %v2138_v22 = vmul.f32 %v2087_v5, %v4384_v54  ;;  %v2291_v6 = vmul.f32 %v2278_v50, %v1892_v10  ;;  %v2091_v12 = vrot.slane %v2029_v44, %v3840_v9 }
 0x581   : >> { %v2545_v29 = vsel %vm2544_vm8, %v2434_v56, %v2543_v55  ;;  %v2438_v8 = vrot.slane %v2437_v25, 2  ;;  %v2492_v33 = vrot.slane %v2491_v60, 4  ;;  %v2391_v47 = vmul.f32 %v4102_v34, %v1619_v23 }
 0x582   : >> { %v2489_v28 = vrot.slane %v2488_v52, 1  ;;  %v2390_v49 = vmul.f32 %v4082_v20, %v1616_v16  ;;  %v2292_v51 = vmul.f32 %v2279_v31, %v1893_v63  ;;  %v1785_v27 = vcombine.high %v4434_v1, %v4434_v1 }
 0x583   : >> { %v2439_v11 = vadd.f32 %v2438_v8, %v2437_v25  ;;  %v2493_v57 = vadd.f32 %v2492_v33, %v2491_v60  ;;  %v1845_v60 = vrot.slane %v1783_v48, %v3840_v9  ;;  %v2300_v8 = vadd.f32 %v2291_v6, %v2138_v22 }
 0x584   : >> { %v2490_v7 = vadd.f32 %v2489_v28, %v2488_v52  ;;  %v2442_v21 = vadd.f32 %v2391_v47, %v2390_v49  ;;  %v1667_v0 = vpop.xlane.xlu0 %1666  ;;  %v1664_v55 = vpop.xlane.xlu1 %1663  ;;  %v2301_v26 = vadd.f32 %v2292_v51, %v2139_v45  ;;  %v2031_v33 = vcombine.high %v4429_v19, %v4429_v19 }
 0x585   : >> { %v2440_v34 = vrot.slane %v2439_v11, 1  ;;  %v2494_v30 = vrot.slane %v2493_v57, 2  ;;  %v2407_v2 = vmul.f32 %v2279_v31, %v1667_v0  ;;  %v2406_v20 = vmul.f32 %v2278_v50, %v1664_v55 }
 0x586   : >> { %v2557_v40 = vsel %vm2544_vm8, %v2490_v7, %v2556_v36  ;;  %v2443_v4 = vrot.slane %v2442_v21, 4  ;;  %v1895_v16 = vmul.f32 %v1845_v60, %v3795_v14  ;;  %v1849_v31 = vrot.slane %v1785_v27, %v3840_v9 }
 0x587   : >> { %v2441_v3 = vadd.f32 %v2440_v34, %v2439_v11  ;;  %v2495_v46 = vadd.f32 %v2494_v30, %v2493_v57  ;;  %v2498_v41 = vadd.f32 %v2407_v2, %v2406_v20  ;;  %v2141_v63 = vmul.f32 %v2091_v12, %v4382_v39 }
 0x588   : >> { %v2444_v56 = vadd.f32 %v2443_v4, %v2442_v21  ;;  %v1625_v18 = vpop.xlane.xlu0 %1624  ;;  %v1622_v25 = vpop.xlane.xlu1 %1621  ;;  %v2314_v21 = vmul.f32 %v2301_v26, %v1895_v16  ;;  %v2140_v0 = vmul.f32 %v2091_v12, %v4388_v35  ;;  %v2095_v6 = vrot.slane %v2031_v33, %v3840_v9 }
 0x589   : >> { %v2547_v58 = vsel %vm2546_vm9, %v2441_v3, %v2545_v29  ;;  %v2496_v54 = vrot.slane %v2495_v46, 1  ;;  %v2499_v59 = vrot.slane %v2498_v41, 4  ;;  %v2393_v36 = vmul.f32 %v4127_v38, %v1625_v18 }
 0x58a   : >> { %v2445_v52 = vrot.slane %v2444_v56, 2  ;;  %v2392_v23 = vmul.f32 %v4243_v24, %v1622_v25  ;;  %v1894_v38 = vmul.f32 %v1845_v60, %v3792_v13  ;;  %v2323_v45 = vadd.f32 %v2314_v21, %v2141_v63 }
 0x58b   : >> { %v2497_v5 = vadd.f32 %v2496_v54, %v2495_v46  ;;  %v2500_v44 = vadd.f32 %v2499_v59, %v2498_v41  ;;  %v1897_v46 = vmul.f32 %v1849_v31, %v3795_v14  ;;  %v1896_v60 = vmul.f32 %v1849_v31, %v3792_v13  ;;  %v2587_v13 = vld [vmem:[#allocation4 + $0x8] sm:$0xff] (%p1095_p4) }
 0x58c   : >> { %v2446_v29 = vadd.f32 %v2445_v52, %v2444_v56  ;;  %v2449_v47 = vadd.f32 %v2393_v36, %v2392_v23  ;;  %v1673_v28 = vpop.xlane.xlu0 %1672  ;;  %v1670_v49 = vpop.xlane.xlu1 %1669  ;;  %v2313_v2 = vmul.f32 %v2300_v8, %v1894_v38  ;;  %v2143_v36 = vmul.f32 %v2095_v6, %v4386_v32 }
 0x58d   : >> { %v2558_v24 = vsel %vm2546_vm9, %v2497_v5, %v2557_v40  ;;  %v2501_v50 = vrot.slane %v2500_v44, 2  ;;  %v2409_v10 = vmul.f32 %v2301_v26, %v1673_v28  ;;  %v2408_v11 = vmul.f32 %v2300_v8, %v1670_v49 }
 0x58e   : >> { %v2447_v1 = vrot.slane %v2446_v29, 1  ;;  %v2450_v57 = vrot.slane %v2449_v47, 4  ;;  %v2322_v25 = vadd.f32 %v2313_v2, %v2140_v0  ;;  %v2336_v16 = vmul.f32 %v2323_v45, %v1897_v46 }
 0x58f   : >> { %v2502_v7 = vadd.f32 %v2501_v50, %v2500_v44  ;;  %v2505_v19 = vadd.f32 %v2409_v10, %v2408_v11  ;;  %v2142_v27 = vmul.f32 %v2095_v6, %v4392_v43 }
 0x590   : >> { %v2448_v55 = vadd.f32 %v2447_v1, %v2446_v29  ;;  %v2451_v48 = vadd.f32 %v2450_v57, %v2449_v47  ;;  %v1631_v34 = vpop.xlane.xlu0 %1630  ;;  %v1628_v30 = vpop.xlane.xlu1 %1627  ;;  %v2335_v33 = vmul.f32 %v2322_v25, %v1896_v60  ;;  %v2345_v0 = vadd.f32 %v2336_v16, %v2143_v36   ;;  %v3284_v60 = vld [vmem:[%s3665_s8 + $0x38] sm:$0xff] (%p1095_p4)   ;;  %v3289_v16 = vld [vmem:[%s3665_s8 + $0x10] sm:$0xff] (%p1095_p4)  }
 0x591   : >> { %v2503_v20 = vrot.slane %v2502_v7, 1  ;;  %v2506_v22 = vrot.slane %v2505_v19, 4  ;;  %v2395_v40 = vmul.f32 %v4168_v37, %v1631_v34  ;;  %v2394_v4 = vmul.f32 %v4255_v42, %v1628_v30  ;;  %3036 = vmatprep.subr.bf16.mxu1 (%p1095_p4), %v3284_v60 }
 0x592   : >> { %v2549_v39 = vsel %vm2548_vm10, %v2448_v55, %v2547_v58  ;;  %v2452_v3 = vrot.slane %v2451_v48, 2  ;;  %v2344_v57 = vadd.f32 %v2335_v33, %v2142_v27   ;;  %3037 = vmatpush3.bf16.msra.mxu1 (%p1095_p4), %v3284_v60  ;;  %v2591_v36 = vsub.f32 (%p1095_p4), 0.0, %v2587_v13  ;;  %v3290_v27 = vld [vmem:[%s3665_s8 + $0x8] sm:$0xff] (%p1095_p4)  }
 0x593   : >> { %v2504_v41 = vadd.f32 %v2503_v20, %v2502_v7  ;;  %v2507_v35 = vadd.f32 %v2506_v22, %v2505_v19  ;;  %v2456_v51 = vadd.f32 %v2395_v40, %v2394_v4 }
 0x594   : >> { %v2453_v12 = vadd.f32 %v2452_v3, %v2451_v48  ;;  %v1679_v56 = vpop.xlane.xlu0 %1678  ;;  %v1676_v18 = vpop.xlane.xlu1 %1675 }
 0x595   : >> { %v2559_v37 = vsel %vm2548_vm10, %v2504_v41, %v2558_v24  ;;  %v2508_v42 = vrot.slane %v2507_v35, 2  ;;  %v2457_v54 = vrot.slane %v2456_v51, 4  ;;  %v2411_v9 = vmul.f32 %v2323_v45, %v1679_v56 }
 0x596   : >> { %v2454_v58 = vrot.slane %v2453_v12, 1  ;;  %v2410_v59 = vmul.f32 %v2322_v25, %v1676_v18 }
 0x597   : >> { %v2509_v52 = vadd.f32 %v2508_v42, %v2507_v35  ;;  %v2458_v23 = vadd.f32 %v2457_v54, %v2456_v51  ;;  %v3286_v42 = vld [vmem:[%s3665_s8 + $0x28] sm:$0xff] (%p1095_p4)   ;;  %v2584_v54 = vld [vmem:[#allocation4 + $0x10] sm:$0xff] (%p1095_p4) }
 0x598   : >> { %v2455_v5 = vadd.f32 %v2454_v58, %v2453_v12  ;;  %v2512_v44 = vadd.f32 %v2411_v9, %v2410_v59  ;;  %v1637_v26 = vpop.xlane.xlu0 %1636  ;;  %v1634_v8 = vpop.xlane.xlu1 %1633  ;;  %v2585_v9 = vld [vmem:[#allocation4] sm:$0xff] (%p1095_p4)  ;;  %v2590_v59 = vsub.f32 (%p1095_p4), 0.0, %v2586_v62 }
 0x599   : >> { %v2510_v29 = vrot.slane %v2509_v52, 1  ;;  %v2459_v47 = vrot.slane %v2458_v23, 2  ;;  %v2397_v28 = vmul.f32 %v4206_v17, %v1637_v26  ;;  %v2396_v49 = vmul.f32 %v4266_v53, %v1634_v8 }
 0x59a   : >> { %v2551_v38 = vsel %vm2550_vm11, %v2455_v5, %v2549_v39  ;;  %v2513_v24 = vrot.slane %v2512_v44, 4  ;;  %v2589_v58 = vsub.f32 (%p1095_p4), 0.0, %v2585_v9  ;;  %v3291_v5 = vld [vmem:[%s3665_s8] sm:$0xff] (%p1095_p4)  }
 0x59b   : >> { %v2511_v32 = vadd.f32 %v2510_v29, %v2509_v52  ;;  %v2460_v50 = vadd.f32 %v2459_v47, %v2458_v23  ;;  %v2463_v10 = vadd.f32 %v2397_v28, %v2396_v49  ;;  %v2596_v52 = vmul.f32 (%p1095_p4), 1.442695, %v2590_v59 }
 0x59c   : >> { %v2514_v11 = vadd.f32 %v2513_v24, %v2512_v44  ;;  %v1685_v43 = vpop.xlane.xlu0 %1684  ;;  %v1682_v1 = vpop.xlane.xlu1 %1681  ;;  %v2598_v23 = vmul.f32 (%p1095_p4), 1.442695, %v2591_v36  ;;  %v2569_v24 = vld [vmem:[#allocation2 + $0x8] sm:$0xff] (%p1095_p4) }
 0x59d   : >> { %v2560_v31 = vsel %vm2550_vm11, %v2511_v32, %v2559_v37  ;;  %v2461_v63 = vrot.slane %v2460_v50, 1  ;;  %v2464_v7 = vrot.slane %v2463_v10, 4  ;;  %v2413_v19 = vmul.f32 %v2345_v0, %v1685_v43  ;;  %v3285_v37 = vld [vmem:[%s3665_s8 + $0x30] sm:$0xff] (%p1095_p4)  }
 0x59e   : >> { %v2515_v21 = vrot.slane %v2514_v11, 2  ;;  %v2412_v55 = vmul.f32 %v2344_v57, %v1682_v1  ;;  %v4575_v1 = vmov %v2344_v57  ;;  %3038 = vmatprep.subr.bf16.mxu1 (%p1095_p4), %v3285_v37  ;;  %v2594_v0 = vmul.f32 (%p1095_p4), 1.442695, %v2589_v58  ;;  %v2570_v32 = vld [vmem:[#allocation2 + $0x10] sm:$0xff] (%p1095_p4) }
 0x59f   : >> { %v2462_v48 = vadd.f32 %v2461_v63, %v2460_v50  ;;  %v2465_v34 = vadd.f32 %v2464_v7, %v2463_v10  ;;  %3039 = vmatpush3.bf16.msra.mxu1 (%p1095_p4), %v3285_v37  ;;  %v2571_v10 = vld [vmem:[#allocation2 + $0x18] sm:$0xff] (%p1095_p4)  ;;  %v2577_v43 = vmul.f32 (%p1095_p4), %v3798_v15, %v2569_v24  ;;  %v2578_v57 = vmul.f32 (%p1095_p4), %v3798_v15, %v2570_v32 }
 0x5a0   : >> { %v2516_v30 = vadd.f32 %v2515_v21, %v2514_v11  ;;  %v2519_v2 = vadd.f32 %v2413_v19, %v2412_v55  ;;  %3040 = vmatprep.subr.bf16.mxu1 (%p1095_p4), %v3286_v42  ;;  %v2579_v63 = vmul.f32 (%p1095_p4), %v3798_v15, %v2571_v10 }
 0x5a1   : >> { %v2553_v20 = vsel %vm2552_vm12, %v2462_v48, %v2551_v38  ;;  %v2466_v22 = vrot.slane %v2465_v34, 2  ;;  %v2568_v38 = vld [vmem:[#allocation2] sm:$0xff] (%p1095_p4) }
 0x5a2   : >> { %v2517_v40 = vrot.slane %v2516_v30, 1  ;;  %v2520_v4 = vrot.slane %v2519_v2, 4  ;;  %v2576_v50 = vmul.f32 (%p1095_p4), %v3798_v15, %v2568_v38 }
 0x5a3   : >> { %v2467_v6 = vadd.f32 %v2466_v22, %v2465_v34  ;;  %3041 = vmatpush3.bf16.msra.mxu1 (%p1095_p4), %v3286_v42  ;;  %v2732_v42 = vld [vmem:[#allocation14 + $0x8] sm:$0xff] (%p1095_p4) }
 0x5a4   : >> { %v2518_v39 = vadd.f32 %v2517_v40, %v2516_v30  ;;  %v2521_v3 = vadd.f32 %v2520_v4, %v2519_v2  ;;  %v4576_v2 = vmov %v4206_v17  ;;  %v3287_v17 = vld [vmem:[%s3665_s8 + $0x20] sm:$0xff] (%p1095_p4)  }
 0x5a5   : >> { %v2468_v46 = vrot.slane %v2467_v6, 1  ;;  %3042 = vmatprep.subr.bf16.mxu1 (%p1095_p4), %v3287_v17 }
 0x5a6   : >> { %v2561_v41 = vsel %vm2552_vm12, %v2518_v39, %v2560_v31  ;;  %v2522_v35 = vrot.slane %v2521_v3, 2 }
 0x5a7   : >> { %v2469_v51 = vadd.f32 %v2468_v46, %v2467_v6  ;;  %3043 = vmatpush3.bf16.msra.mxu1 (%p1095_p4), %v3287_v17 }
 0x5a8   : >> { %v2523_v45 = vadd.f32 %v2522_v35, %v2521_v3  ;;  %v4577_v3 = vmov %v4266_v53  ;;  %v2588_v53 = vsub.f32 (%p1095_p4), 0.0, %v2584_v54  ;;  %3044 = vmatprep.subr.bf16.mxu1 (%p1095_p4), %v3288_v61 }
 0x5a9   : >> { %v2555_v12 = vsel %vm2554_vm13, %v2469_v51, %v2553_v20  ;;  %v2733_v51 = vld [vmem:[#allocation14 + $0x10] sm:$0xff] (%p1095_p4) }
 0x5aa   : >> { %2566 = vst [vmem:[%s2565_s12] sm:$0xff] %v2555_v12  ;;  %v2524_v56 = vrot.slane %v2523_v45, 1  ;;  %v2592_v14 = vmul.f32 (%p1095_p4), 1.442695, %v2588_v53  ;;  %v2731_v12 = vld [vmem:[#allocation14] sm:$0xff] (%p1095_p4) }
 0x5ab   : > { %1097 = sbr.rel (!%p1095_p4) target bundleno = 953 (0x3b9), region = 136  ;;  %3045 = vmatpush3.bf16.msra.mxu1 (%p1095_p4), %v3288_v61 }
 0x5ac   : >> { %v2525_v18 = vadd.f32 %v2524_v56, %v2523_v45  ;;  %3292 = vpow2.f32 (%p1095_p4), %v2592_v14  ;;  %3046 = vmatprep.subr.bf16.mxu1 (%p1095_p4), %v3289_v16 }
 0x5ad   : > { %3294 = vpow2.f32 (%p1095_p4), %v2594_v0 }
 0x5ae   : >> { %v2562_v25 = vsel %vm2554_vm13, %v2525_v18, %v2561_v41  ;;  %3296 = vpow2.f32 (%p1095_p4), %v2596_v52 }
 0x5af   : >> { %2567 = vst [vmem:[%s2565_s12 + $0x10] sm:$0xff] %v2562_v25  ;;  %3298 = vpow2.f32 (%p1095_p4), %v2598_v23  ;;  %3047 = vmatpush3.bf16.msra.mxu1 (%p1095_p4), %v3289_v16  ;;  %v2734_v25 = vld [vmem:[#allocation14 + $0x18] sm:$0xff] (%p1095_p4) }
 0x5b0   : > { %3048 = vmatprep.subr.bf16.mxu1 %v3290_v27 }
 0x5b3   : > { %3049 = vmatpush3.bf16.msra.mxu1 %v3290_v27 }
 0x5b4   : > { %3050 = vmatprep.subr.bf16.mxu1 %v3291_v5 }
 0x5b6   : > { %v2572_v11 = vld [vmem:[#allocation6] sm:$0xff]  ;;  %v2573_v1 = vld [vmem:[#allocation6 + $0x8] sm:$0xff]  ;;  %v2574_v31 = vld [vmem:[#allocation6 + $0x10] sm:$0xff] }
 0x5b7   : > { %3051 = vmatpush3.bf16.msra.mxu1 %v3291_v5  ;;  %v2580_v7 = vadd.f32 %v2576_v50, %v2572_v11  ;;  %v2575_v19 = vld [vmem:[#allocation6 + $0x18] sm:$0xff]  ;;  %v2581_v55 = vadd.f32 %v2577_v43, %v2573_v1  ;;  %v2582_v30 = vadd.f32 %v2578_v57, %v2574_v31 }
 0x5b8   : > { %v2583_v22 = vadd.f32 %v2579_v63, %v2575_v19 }
 0x5b9   : > { %v3293_v44 = vpop.eup %3292 }
 0x5ba   : > { %v3295_v26 = vpop.eup %3294  ;;  %v2600_v8 = vadd.f32 1.0, %v3293_v44 }
 0x5bb   : > { %v3297_v33 = vpop.eup %3296  ;;  %v2601_v29 = vadd.f32 1.0, %v3295_v26 }
 0x5bc   : > { %v3299_v47 = vpop.eup %3298  ;;  %3300 = vrcp.f32 %v2600_v8  ;;  %v2602_v28 = vadd.f32 1.0, %v3297_v33 }
 0x5bd   : > { %3302 = vrcp.f32 %v2601_v29  ;;  %v2603_v49 = vadd.f32 1.0, %v3299_v47 }
 0x5be   : > { %3304 = vrcp.f32 %v2602_v28 }
 0x5bf   : > { %3306 = vrcp.f32 %v2603_v49 }
 0x5c9   : > { %v3301_v21 = vpop.eup %3300 }
 0x5ca   : > { %v3303_v48 = vpop.eup %3302  ;;  %v2608_v34 = vmul.f32 %v3301_v21, %v2584_v54 }
 0x5cb   : > { %v3305_v2 = vpop.eup %3304  ;;  %v2609_v20 = vmul.f32 %v3303_v48, %v2585_v9 }
 0x5cc   : > { %v3307_v40 = vpop.eup %3306  ;;  %v2612_v4 = vmul.f32 %v2608_v34, %v2580_v7  ;;  %v2610_v6 = vmul.f32 %v3305_v2, %v2586_v62 }
 0x5cd   : > { %v2613_v39 = vmul.f32 %v2609_v20, %v2581_v55  ;;  %v2611_v3 = vmul.f32 %v3307_v40, %v2587_v13 }
 0x5ce   : > { %v2614_v46 = vmul.f32 %v2610_v6, %v2582_v30 }
 0x5cf   : > { %v2632_v41 = vpack.c.bf16 %v2613_v39, %v2612_v4  ;;  %v2615_v35 = vmul.f32 %v2611_v3, %v2583_v22 }
 0x5d1   : > { %3052 = vmatprep.mubr.bf16.mxu1 %v2632_v41  ;;  %v2633_v15 = vpack.c.bf16 %v2615_v35, %v2614_v46 }
 0x5d3   : > { %3053 = vmatmul.mubr.bf16.vlgmr.msra.gmra.mxu1 %v2633_v15 }
 0x693   : > { %v3054_v45 = vpop.f32.mrf.mxu1 }
 0x694   : > { %v2737_v56 = vadd.f32 %v3054_v45, %v2733_v51 }
 0x695   : > { %v2716_v18 = vpop.f32.mrf.mxu1 }
 0x696   : > { %2741 = vst [vmem:[#allocation14 + $0x10] sm:$0xff] %v2737_v56  ;;  %v2735_v60 = vadd.f32 %v2731_v12, %v2716_v18 }
 0x697   : > { %v3055_v37 = vpop.f32.mrf.mxu1 }
 0x698   : > { %2739 = vst [vmem:[#allocation14] sm:$0xff] %v2735_v60  ;;  %v2738_v17 = vadd.f32 %v3055_v37, %v2734_v25 }
 0x699   : > { %v2719_v54 = vpop.f32.mrf.mxu1 }
 0x69a   : > { %2742 = vst [vmem:[#allocation14 + $0x18] sm:$0xff] %v2738_v17  ;;  %v2736_v9 = vadd.f32 %v2732_v42, %v2719_v54 }
 0x69c   : > { %2740 = vst [vmem:[#allocation14 + $0x8] sm:$0xff] %v2736_v9 }
 0x69d   : > { %3375 = shalt.err (!%p3372_p3)
}
 0x69e   : > { %s3496_s11 = smov 128   ;;  %s3497_s9 = smov 8  }
 0x69f   : > { %3064 = dma.vmem_to_hbm [thread:$0]  (%p4520_p9), %s2754_s18, 512, %s4560_s7, [#allocation11], %s3496_s11, %s3496_s11, %s3497_s9  }
 0x6a0   : > { %3439 = dma.done.wait (%p4520_p9), [#allocation11], 512  }
 0x6a1   : > { %3441 = vsyncadd (%p4520_p9), [#allocation11], 4294966784 }
 0x6a2 PF: > { %s22_s29 = sadd.s32 1, %s3464_s29   ;;  %s4580_s16 = smov %s3614_s24 }
 0x6a3   : > { %p19_p6 = scmp.ge.s32.totalorder %s22_s29, 4   ;;  %s4581_s24 = smov %s3448_s25 }
 0x6a4   : > { %s4582_s25 = smov %s3452_s26  ;;  %s4583_s26 = smov %s4580_s16 }
 0x6a5   : > { %s4584_s27 = smov %s3460_s28  ;;  %s4585_s28 = smov %s4587_s14 }
 0x6a6   :  { %21 = sbr.rel (!%p19_p6) target bundleno = 9 (0x9), region = 147 }
 0x6ab   :  { %2769 = vsyncpa [#allocation10], 1 }
 0x6ac   :  { %2771 = vsyncpa [#allocation10 + $0x1], 1 }
 0x6ad   :  { %2772 = vsyncpa [#allocation13], 1 }
 0x6ae   :  { %2774 = vsyncpa [#allocation13 + $0x1], 1 }
 0x6af   :  { %2775 = vsyncpa [#allocation11], 1 }
 0x6b0   :  { %2777 = vsyncpa [#allocation11 + $0x1], 1 }

</bundles_post_ra>
